<compile_context>
chip_gen: v6e
topology: v6e:2x2x1
jax: 0.10.0
libtpu: 0.0.40
codegen_flags: <defaults>
</compile_context>

<pallas_src>
import functools

import jax
import jax.numpy as jnp
from jax.experimental import pallas as pl
from jax.experimental.pallas import tpu as pltpu


# If True, also trace the D_x / D_z branches (their outputs are discarded, as
# in the PyTorch forward).  Off by default: they never feed the return value.
COMPUTE_UNUSED_BRANCHES = False


# -----------------------------------------------------------------------------
# Pallas kernel: fully fused, single-step D_xz
#   out = ( LeakyReLU_0.1( y @ W1 + b1 ) ) @ W2 + b2
# No grid pipeline needed: W1 (1024x1024 bf16 = 2 MiB) fits in VMEM, the
# intermediate h stays in registers, and the N=1 second Linear is a VPU
# multiply + lane reduce.
# -----------------------------------------------------------------------------
def _dxz_fused_kernel(y_ref, w1_ref, b1_ref, w2_ref, b2_ref, o_ref):
    # bf16 x bf16 -> f32 on the MXU; bias folded straight onto the result.
    h = jnp.dot(y_ref[...], w1_ref[...], preferred_element_type=jnp.float32)
    h = h + b1_ref[...]                      # (M_pad, 1024) f32, bias broadcast
    h = jnp.maximum(h, 0.1 * h)              # LeakyReLU(0.1)
    # TODO(synk): Dropout treated as identity (eval mode).
    # Second Linear (1024 -> 1): VPU multiply + lane reduce.
    out = jnp.sum(h * w2_ref[...], axis=-1, keepdims=True) + b2_ref[...]
    o_ref[...] = out.astype(o_ref.dtype)


def d_xz_forward(y, w1_bf16, b1, w2_row, b2):
    """y: (M, K); w1: (K, 1024) bf16; b1: (1, 1024) f32;
    w2_row: (1, 1024) f32; b2: (1, 1) f32 -> (M, 1) f32."""
    M, K = y.shape
    Kw, N = w1_bf16.shape
    assert K == Kw

    # Pad rows to a multiple of 8 for sublane density (padded rows sliced off).
    M_pad = max(8, ((M + 7) // 8) * 8)
    if M_pad != M:
        y = jnp.pad(y, ((0, M_pad - M), (0, 0)))
    y = y.astype(jnp.bfloat16)

    out = pl.pallas_call(
        _dxz_fused_kernel,
        out_shape=jax.ShapeDtypeStruct((M_pad, 1), jnp.float32),
        grid=(1,),                                      # single step, no K pipeline
        in_specs=[
            pl.BlockSpec((M_pad, K), lambda i: (0, 0)),  # y  (whole array)
            pl.BlockSpec((K, N), lambda i: (0, 0)),      # W1 (whole array, 2 MiB bf16)
            pl.BlockSpec((1, N), lambda i: (0, 0)),      # b1
            pl.BlockSpec((1, N), lambda i: (0, 0)),      # W2 as row vector
            pl.BlockSpec((1, 1), lambda i: (0, 0)),      # b2 (could live in SMEM; negligible)
        ],
        out_specs=pl.BlockSpec((M_pad, 1), lambda i: (0, 0)),
        compiler_params=pltpu.CompilerParams(
            dimension_semantics=("arbitrary",),
            vmem_limit_bytes=32 * 1024 * 1024,           # safe on v5e/v6e/v7x
        ),
    )(y, w1_bf16, b1, w2_row, b2)
    return out[:M]


# -----------------------------------------------------------------------------
# Generic fused  out = [leaky_relu_0.1]( x @ w [+ b] )  (used by D_x / D_z)
# Only traced when COMPUTE_UNUSED_BRANCHES is True; results never feed the
# returned value (matching the PyTorch forward, which discards x_out / z_out).
# -----------------------------------------------------------------------------
def _fused_matmul_kernel(*refs, has_bias: bool, leaky: bool):
    if has_bias:
        x_ref, w_ref, b_ref, o_ref = refs
    else:
        x_ref, w_ref, o_ref = refs

    acc = jnp.dot(x_ref[...], w_ref[...], preferred_element_type=jnp.float32)
    if has_bias:
        acc = acc + b_ref[...]                   # (1, N) broadcast over rows
    if leaky:
        acc = jnp.maximum(acc, 0.1 * acc)        # LeakyReLU(0.1)
    o_ref[...] = acc.astype(o_ref.dtype)


def fused_matmul(x, w, b=None, *, leaky=False):
    """x: (M, K), w: (K, N) bf16, b: (1, N) f32 or None -> (M, N) float32."""
    M, K = x.shape
    K2, N = w.shape
    assert K == K2

    kernel = functools.partial(
        _fused_matmul_kernel, has_bias=(b is not None), leaky=leaky
    )

    in_specs = [
        pl.BlockSpec((M, K), lambda i: (0, 0)),
        pl.BlockSpec((K, N), lambda i: (0, 0)),
    ]
    args = [x.astype(jnp.bfloat16), w.astype(jnp.bfloat16)]
    if b is not None:
        in_specs.append(pl.BlockSpec((1, N), lambda i: (0, 0)))
        args.append(b)

    return pl.pallas_call(
        kernel,
        out_shape=jax.ShapeDtypeStruct((M, N), jnp.float32),
        grid=(1,),
        in_specs=in_specs,
        out_specs=pl.BlockSpec((M, N), lambda i: (0, 0)),
        compiler_params=pltpu.CompilerParams(
            dimension_semantics=("arbitrary",),
            vmem_limit_bytes=32 * 1024 * 1024,
        ),
    )(*args)


# -----------------------------------------------------------------------------
# Glue: im2col for Conv2d(kernel=4, stride=2, pad=1, bias=False)  (NHWC)
# -----------------------------------------------------------------------------
def im2col(x_nhwc, kh, kw, stride, pad):
    N, H, W, C = x_nhwc.shape
    x_p = jnp.pad(x_nhwc, ((0, 0), (pad, pad), (pad, pad), (0, 0)))
    OH = (H + 2 * pad - kh) // stride + 1
    OW = (W + 2 * pad - kw) // stride + 1
    patches = []
    for i in range(kh):
        for j in range(kw):
            patches.append(
                x_p[:, i:i + OH * stride:stride, j:j + OW * stride:stride, :]
            )
    # (N, OH, OW, KH*KW, C) -> (N*OH*OW, KH*KW*C); ordering = (kh, kw, cin)
    cols = jnp.stack(patches, axis=3)
    return cols.reshape(N * OH * OW, kh * kw * C), (N, OH, OW)


# -----------------------------------------------------------------------------
# Parameter construction (deterministic, synthetic)
# -----------------------------------------------------------------------------
def make_params(key, *, input_size, z_dim, channel, ndf):
    assert input_size % 16 == 0
    cndf, tisize = ndf * 2, 16
    while tisize != input_size:
        cndf = cndf // 2
        tisize = tisize * 2
    # With input_size = 32 there are no pyramid layers: just initial + last conv.
    assert input_size == 32, "this synthetic setup builds: initial conv + last conv"

    keys = jax.random.split(key, 8)
    s = 0.02
    d_xz_in = 512 + cndf * 8 * 8
    params = {
        # conv weights stored directly in im2col layout (KH*KW*Cin, Cout), bf16
        "conv1_w": (jax.random.normal(keys[0], (4 * 4 * channel, cndf), jnp.float32) * s
                    ).astype(jnp.bfloat16),
        "conv2_w": (jax.random.normal(keys[1], (4 * 4 * cndf, cndf), jnp.float32) * s
                    ).astype(jnp.bfloat16),
        # D_z : Linear(z_dim, 512)
        "dz_w": (jax.random.normal(keys[2], (z_dim, 512), jnp.float32) * s
                 ).astype(jnp.bfloat16),
        "dz_b": (jax.random.normal(keys[3], (512,), jnp.float32) * s).reshape(1, 512),
        # D_xz : Linear(d_xz_in, 1024) -> LeakyReLU -> Dropout -> Linear(1024, 1)
        "dxz1_w": (jax.random.normal(keys[4], (d_xz_in, 1024), jnp.float32) * s
                   ).astype(jnp.bfloat16),
        "dxz1_b": (jax.random.normal(keys[5], (1024,), jnp.float32) * s).reshape(1, 1024),
        # second Linear stored as a (1, 1024) row (used as VPU mul + lane reduce)
        "dxz2_w_row": (jax.random.normal(keys[6], (1024,), jnp.float32) * s
                       ).reshape(1, 1024),
        "dxz2_b": (jax.random.normal(keys[7], (1,), jnp.float32) * s).reshape(1, 1),
    }
    return params, cndf


# -----------------------------------------------------------------------------
# Forward pass (mirrors Discriminator.forward: returns D_xz(y) only)
# -----------------------------------------------------------------------------
@jax.jit
def discriminator_forward(params, x_nchw, z, y):
    if COMPUTE_UNUSED_BRANCHES:
        # D_x(x) and D_z(z): computed only for parity with the PyTorch forward;
        # the reference discards their results, so by default we skip tracing
        # them entirely (same returned value, less compile work).
        x = jnp.transpose(x_nchw, (0, 2, 3, 1))            # NCHW -> NHWC
        cols1, (n, oh, ow) = im2col(x, 4, 4, 2, 1)
        h = fused_matmul(cols1, params["conv1_w"], None, leaky=True)
        h = h.reshape(n, oh, ow, -1)
        cols2, (n, oh2, ow2) = im2col(h, 4, 4, 2, 1)
        _x_out = fused_matmul(cols2, params["conv2_w"], None, leaky=True)
        _x_out = _x_out.reshape(n, oh2, ow2, -1)            # unused (as in reference)
        _z_out = fused_matmul(z, params["dz_w"], params["dz_b"], leaky=True)  # unused

    # ---- D_xz(y): single fused Pallas kernel (Linear -> LeakyReLU -> [Dropout] -> Linear)
    return d_xz_forward(
        y, params["dxz1_w"], params["dxz1_b"], params["dxz2_w_row"], params["dxz2_b"]
    )


# -----------------------------------------------------------------------------
if __name__ == "__main__":
    batch = 2
    input_size = 32
    channel = 3
    ndf = 8
    z_dim = 16

    key = jax.random.PRNGKey(0)
    k_param, k_x, k_z, k_y = jax.random.split(key, 4)

    params, cndf = make_params(
        k_param, input_size=input_size, z_dim=z_dim, channel=channel, ndf=ndf
    )

    x = jax.random.normal(k_x, (batch, channel, input_size, input_size), jnp.float32)
    z = jax.random.normal(k_z, (batch, z_dim), jnp.float32)
    y = jax.random.normal(k_y, (batch, 512 + cndf * 8 * 8), jnp.float32)

    out = discriminator_forward(params, x, z, y)
    out = jax.block_until_ready(out)
    assert out.shape == (batch, 1), out.shape
    print("KERNEL_OK")
</pallas_src>

<mosaic_0001>
module attributes {stable_mosaic.version = 11 : i64} {
  func.func @_dxz_fused_kernel(%arg0: i32, %arg1: memref<8x1024xbf16, #tpu.memory_space<vmem>>, %arg2: memref<1024x1024xbf16, #tpu.memory_space<vmem>>, %arg3: memref<1x1024xf32, #tpu.memory_space<vmem>>, %arg4: memref<1x1024xf32, #tpu.memory_space<vmem>>, %arg5: memref<1x1xf32, #tpu.memory_space<vmem>>, %arg6: memref<8x1xf32, #tpu.memory_space<vmem>>) attributes {dimension_semantics = [#tpu.dimension_semantics<arbitrary>], iteration_bounds = array<i64: 1>, scalar_prefetch = 0 : i64, scratch_operands = 0 : i64, tpu.core_type = #tpu.core_type<tc>, window_params = [{pipeline_mode = #tpu.pipeline_mode<synchronous>, transform_indices = @transform_0, window_bounds = array<i64: 8, 1024>}, {pipeline_mode = #tpu.pipeline_mode<synchronous>, transform_indices = @transform_1, window_bounds = array<i64: 1024, 1024>}, {pipeline_mode = #tpu.pipeline_mode<synchronous>, transform_indices = @transform_2, window_bounds = array<i64: 1, 1024>}, {pipeline_mode = #tpu.pipeline_mode<synchronous>, transform_indices = @transform_3, window_bounds = array<i64: 1, 1024>}, {pipeline_mode = #tpu.pipeline_mode<synchronous>, transform_indices = @transform_4, window_bounds = array<i64: 1, 1>}, {pipeline_mode = #tpu.pipeline_mode<synchronous>, transform_indices = @transform_5, window_bounds = array<i64: 8, 1>}]} {
    %c0 = arith.constant 0 : index
    %c0_0 = arith.constant 0 : index
    %0 = vector.load %arg1[%c0, %c0_0] : memref<8x1024xbf16, #tpu.memory_space<vmem>>, vector<8x1024xbf16>
    %c0_1 = arith.constant 0 : index
    %c0_2 = arith.constant 0 : index
    %1 = vector.load %arg2[%c0_1, %c0_2] : memref<1024x1024xbf16, #tpu.memory_space<vmem>>, vector<1024x1024xbf16>
    %cst = arith.constant dense<0.000000e+00> : vector<8x1024xf32>
    %2 = tpu.matmul %0, %1, %cst {dimension_numbers = #tpu.dot_dimension_numbers<[1], [0], [0], [1], [0, 0, 1, 1], [], []>} : vector<8x1024xbf16>, vector<1024x1024xbf16>, vector<8x1024xf32> -> vector<8x1024xf32>
    %c0_3 = arith.constant 0 : index
    %c0_4 = arith.constant 0 : index
    %3 = vector.load %arg3[%c0_3, %c0_4] : memref<1x1024xf32, #tpu.memory_space<vmem>>, vector<1x1024xf32>
    %4 = vector.broadcast %3 : vector<1x1024xf32> to vector<8x1024xf32>
    %5 = arith.addf %2, %4 : vector<8x1024xf32>
    %cst_5 = arith.constant 1.000000e-01 : f32
    %6 = vector.broadcast %cst_5 : f32 to vector<8x1024xf32>
    %7 = arith.mulf %6, %5 : vector<8x1024xf32>
    %8 = arith.maximumf %5, %7 : vector<8x1024xf32>
    %c0_6 = arith.constant 0 : index
    %c0_7 = arith.constant 0 : index
    %9 = vector.load %arg4[%c0_6, %c0_7] : memref<1x1024xf32, #tpu.memory_space<vmem>>, vector<1x1024xf32>
    %10 = vector.broadcast %9 : vector<1x1024xf32> to vector<8x1024xf32>
    %11 = arith.mulf %8, %10 : vector<8x1024xf32>
    %cst_8 = arith.constant dense<0.000000e+00> : vector<8xf32>
    %12 = vector.multi_reduction <add>, %11, %cst_8 [1] : vector<8x1024xf32> to vector<8xf32>
    %13 = vector.shape_cast %12 : vector<8xf32> to vector<8x1xf32>
    %c0_9 = arith.constant 0 : index
    %c0_10 = arith.constant 0 : index
    %14 = vector.load %arg5[%c0_9, %c0_10] : memref<1x1xf32, #tpu.memory_space<vmem>>, vector<1x1xf32>
    %15 = vector.broadcast %14 : vector<1x1xf32> to vector<8x1xf32>
    %16 = arith.addf %13, %15 : vector<8x1xf32>
    %c0_11 = arith.constant 0 : index
    %c0_12 = arith.constant 0 : index
    %17 = vector.load %arg6[%c0_11, %c0_12] : memref<8x1xf32, #tpu.memory_space<vmem>>, vector<8x1xf32>
    tpu.vector_store %arg6[%c0_11, %c0_12], %16 {strides = array<i32>} : memref<8x1xf32, #tpu.memory_space<vmem>>, vector<8x1xf32>,
    return
  }
  func.func @transform_0(%arg0: i32) -> (i32, i32) {
    %c0_i32 = arith.constant 0 : i32
    %c0_i32_0 = arith.constant 0 : i32
    %c0_i32_1 = arith.constant 0 : i32
    return %c0_i32, %c0_i32_0 : i32, i32
  }
  func.func @transform_1(%arg0: i32) -> (i32, i32) {
    %c0_i32 = arith.constant 0 : i32
    %c0_i32_0 = arith.constant 0 : i32
    %c0_i32_1 = arith.constant 0 : i32
    return %c0_i32, %c0_i32_0 : i32, i32
  }
  func.func @transform_2(%arg0: i32) -> (i32, i32) {
    %c0_i32 = arith.constant 0 : i32
    %c0_i32_0 = arith.constant 0 : i32
    %c0_i32_1 = arith.constant 0 : i32
    return %c0_i32, %c0_i32_0 : i32, i32
  }
  func.func @transform_3(%arg0: i32) -> (i32, i32) {
    %c0_i32 = arith.constant 0 : i32
    %c0_i32_0 = arith.constant 0 : i32
    %c0_i32_1 = arith.constant 0 : i32
    return %c0_i32, %c0_i32_0 : i32, i32
  }
  func.func @transform_4(%arg0: i32) -> (i32, i32) {
    %c0_i32 = arith.constant 0 : i32
    %c0_i32_0 = arith.constant 0 : i32
    %c0_i32_1 = arith.constant 0 : i32
    return %c0_i32, %c0_i32_0 : i32, i32
  }
  func.func @transform_5(%arg0: i32) -> (i32, i32) {
    %c0_i32 = arith.constant 0 : i32
    %c0_i32_0 = arith.constant 0 : i32
    %c0_i32_1 = arith.constant 0 : i32
    return %c0_i32, %c0_i32_0 : i32, i32
  }
}

</mosaic_0001>

<bundles_post_ra>
// kernel: discriminator_forward.1
= control target key start
LH: loop header
LB: loop body
LE: loop exit
PB: predicated region body
PF: predicated region fallthrough
CT: control target
= control target key end

     0   :  { %s4742_s0 = inlined_call_operand.vmem [shape: bf16[8,1024], index: 0, kind: input, shape index: {}]   ;;  %s4743_s1 = inlined_call_operand.hbm [shape: bf16[1024,1024], index: 1, kind: input, shape index: {}]   ;;  %s4744_s2 = inlined_call_operand.hbm [shape: f32[1,1024], index: 2, kind: input, shape index: {}]   ;;  %s4745_s3 = inlined_call_operand.hbm [shape: f32[1,1024], index: 3, kind: input, shape index: {}]   ;;  %s4746_s4 = inlined_call_operand.<no memory space> [shape: f32[1,1], index: 4, kind: input, shape index: {}]   ;;  %s4747_s5 = inlined_call_operand.vmem [shape: f32[8,1], index: 5, kind: output, shape index: {}]  }
   0x1   :  { %v10_v0 = vstv %s4746_s4 }
   0x2   :  { %11 = vst [vmem:[#allocation2] sm:$0x1] %v10_v0 }
   0x3   :  { %12 = vsyncpa [#allocation4], 0 }
   0x4   :  { %13 = vsyncpa [#allocation6], 0  ;;  %s4552_s20 = smov [#allocation5]   ;;  %s4553_s22 = smov [#allocation3]  }
   0x5   :  { %s34_s21 = sshll.u32 %s4552_s20, 4  ;;  %s21_s23 = sshll.u32 %s4553_s22, 4  ;;  %s35_s21 = int_to_ptr.vmem [resolvable:$true] %s34_s21  ;;  %s22_s23 = int_to_ptr.vmem [resolvable:$true] %s21_s23 }
   0x6   :  { %s4496_s24 = scalar_lea.vmem %s35_s21, 128  ;;  %p4501_p1 = scmp.lt.s32.totalorder %s35_s21, %s35_s21 }
   0x7   :  { %p4497_p0 = scmp.ne.s32.totalorder %s35_s21, %s4496_s24  ;;  %p4502_p2 = scmp.lt.s32.totalorder %s4496_s24, %s4496_s24 }
   0x9   :  { %p4503_p3 = por %p4502_p2, %p4501_p1 }
   0xb   :  { %p4504_p4 = pnand %p4503_p3, %p4497_p0 }
   0xd   :  { %4507 = shalt.err (!%p4504_p4)
}
   0xe   :  { %37 = dma.hbm_to_vmem [thread:$0]  %s4744_s2, 128, %s35_s21, [#allocation6]  }
   0xf   :  { %s4516_s4 = scalar_lea.vmem %s22_s23, 65536  ;;  %p4521_p6 = scmp.lt.s32.totalorder %s22_s23, %s22_s23 }
  0x10   :  { %p4517_p5 = scmp.ne.s32.totalorder %s22_s23, %s4516_s4  ;;  %p4522_p7 = scmp.lt.s32.totalorder %s4516_s4, %s4516_s4 }
  0x12   :  { %p4523_p8 = por %p4522_p7, %p4521_p6 }
  0x14   :  { %p4524_p9 = pnand %p4523_p8, %p4517_p5 }
  0x16   :  { %4527 = shalt.err (!%p4524_p9)
}
  0x17   :  { %s4554_s27 = smov 512   ;;  %s4555_s28 = smov 32  }
  0x18   :  { %27 = dma.hbm_to_vmem [thread:$0]  %s4743_s1, 65536, %s22_s23, [#allocation4], %s4554_s27, %s4554_s27, %s4555_s28  }
  0x19   :  { %s4556_s6 = smov [#allocation7]  }
  0x1a   :  { %s44_s7 = sshll.u32 %s4556_s6, 4  ;;  %s45_s7 = int_to_ptr.vmem [resolvable:$true] %s44_s7 }
  0x1b   :  { %s4536_s8 = scalar_lea.vmem %s45_s7, 128  ;;  %p4541_p11 = scmp.lt.s32.totalorder %s45_s7, %s45_s7 }
  0x1c   :  { %p4537_p10 = scmp.ne.s32.totalorder %s45_s7, %s4536_s8  ;;  %p4542_p12 = scmp.lt.s32.totalorder %s4536_s8, %s4536_s8 }
  0x1e   :  { %p4543_p13 = por %p4542_p12, %p4541_p11 }
  0x20   :  { %p4544_p0 = pnand %p4543_p13, %p4537_p10 }
  0x22   :  { %4547 = shalt.err (!%p4544_p0)
}
  0x23   :  { %47 = dma.hbm_to_vmem [thread:$0]  %s4745_s3, 128, %s45_s7, [#allocation6]  }
  0x24   :  { %4548 = dma.done.wait [#allocation4], 65536  }
  0x25   :  { %4549 = vsyncadd [#allocation4], 4294901760 }
  0x26   :  { %4550 = dma.done.wait [#allocation6], 256  }
  0x27   :  { %4551 = vsyncadd [#allocation6], 4294967040  ;;  %v119_v1 = vld [vmem:[#allocation3 + $0x1c0] sm:$0xff]  ;;  %vm3944_vm0 = vcmask 7168  }
  0x28   :  { %v123_v2 = vld [vmem:[#allocation3 + $0x1e0] sm:$0xff] }
  0x29   :  { %v247_v3 = vld [vmem:[#allocation3 + $0x5c0] sm:$0xff]  ;;  %v4017_v4 = vcombine.high %v119_v1, %v123_v2  ;;  %v4016_v6 = vcombine.low %v119_v1, %v123_v2 }
  0x2a   :  { %v251_v5 = vld [vmem:[#allocation3 + $0x5e0] sm:$0xff] }
  0x2b   :  { %v111_v7 = vld [vmem:[#allocation3 + $0x180] sm:$0xff]  ;;  %v4145_v9 = vcombine.high %v247_v3, %v251_v5  ;;  %v4144_v10 = vcombine.low %v247_v3, %v251_v5  ;;  %3205 = vmatprep.subr.bf16.mxu0 %v4017_v4 }
  0x2c   :  { %v115_v8 = vld [vmem:[#allocation3 + $0x1a0] sm:$0xff]  ;;  %3206 = vmatpush1.bf16.msra.mxu0 %v4016_v6 }
  0x2d   :  { %v4009_v11 = vcombine.high %v111_v7, %v115_v8  ;;  %v239_v12 = vld [vmem:[#allocation3 + $0x580] sm:$0xff]  ;;  %3246 = vmatprep.subr.bf16.mxu1 %v4145_v9  ;;  %v4008_v19 = vcombine.low %v111_v7, %v115_v8 }
  0x2e   :  { %v243_v13 = vld [vmem:[#allocation3 + $0x5a0] sm:$0xff]  ;;  %3247 = vmatpush1.bf16.msra.mxu1 %v4144_v10 }
  0x2f   :  { %v103_v14 = vld [vmem:[#allocation3 + $0x140] sm:$0xff]  ;;  %v4137_v15 = vcombine.high %v239_v12, %v243_v13  ;;  %3207 = vmatprep.subr.bf16.mxu0 %v4009_v11  ;;  %v4136_v20 = vcombine.low %v239_v12, %v243_v13 }
  0x30   :  { %v107_v16 = vld [vmem:[#allocation3 + $0x160] sm:$0xff]  ;;  %3208 = vmatpush1.bf16.msra.mxu0 %v4008_v19 }
  0x31   :  { %v231_v17 = vld [vmem:[#allocation3 + $0x540] sm:$0xff]  ;;  %v4001_v21 = vcombine.high %v103_v14, %v107_v16  ;;  %3248 = vmatprep.subr.bf16.mxu1 %v4137_v15  ;;  %v4000_v27 = vcombine.low %v103_v14, %v107_v16 }
  0x32   :  { %v235_v18 = vld [vmem:[#allocation3 + $0x560] sm:$0xff]  ;;  %3249 = vmatpush1.bf16.msra.mxu1 %v4136_v20 }
  0x33   :  { %v4129_v22 = vcombine.high %v231_v17, %v235_v18  ;;  %v95_v23 = vld [vmem:[#allocation3 + $0x100] sm:$0xff]  ;;  %3209 = vmatprep.subr.bf16.mxu0 %v4001_v21  ;;  %v4128_v28 = vcombine.low %v231_v17, %v235_v18 }
  0x34   :  { %v99_v24 = vld [vmem:[#allocation3 + $0x120] sm:$0xff]  ;;  %3210 = vmatpush1.bf16.msra.mxu0 %v4000_v27 }
  0x35   :  { %v223_v25 = vld [vmem:[#allocation3 + $0x500] sm:$0xff]  ;;  %v3993_v29 = vcombine.high %v95_v23, %v99_v24  ;;  %3250 = vmatprep.subr.bf16.mxu1 %v4129_v22  ;;  %v3992_v35 = vcombine.low %v95_v23, %v99_v24 }
  0x36   :  { %v227_v26 = vld [vmem:[#allocation3 + $0x520] sm:$0xff]  ;;  %3251 = vmatpush1.bf16.msra.mxu1 %v4128_v28 }
  0x37   :  { %v4121_v30 = vcombine.high %v223_v25, %v227_v26  ;;  %v87_v31 = vld [vmem:[#allocation3 + $0xc0] sm:$0xff]  ;;  %3211 = vmatprep.subr.bf16.mxu0 %v3993_v29  ;;  %v4120_v36 = vcombine.low %v223_v25, %v227_v26 }
  0x38   :  { %v91_v32 = vld [vmem:[#allocation3 + $0xe0] sm:$0xff]  ;;  %3212 = vmatpush1.bf16.msra.mxu0 %v3992_v35 }
  0x39   :  { %v215_v33 = vld [vmem:[#allocation3 + $0x4c0] sm:$0xff]  ;;  %v3985_v37 = vcombine.high %v87_v31, %v91_v32  ;;  %3252 = vmatprep.subr.bf16.mxu1 %v4121_v30  ;;  %v3984_v43 = vcombine.low %v87_v31, %v91_v32 }
  0x3a   :  { %v219_v34 = vld [vmem:[#allocation3 + $0x4e0] sm:$0xff]  ;;  %3253 = vmatpush1.bf16.msra.mxu1 %v4120_v36 }
  0x3b   :  { %v4113_v38 = vcombine.high %v215_v33, %v219_v34  ;;  %v79_v39 = vld [vmem:[#allocation3 + $0x80] sm:$0xff]  ;;  %3213 = vmatprep.subr.bf16.mxu0 %v3985_v37  ;;  %v4112_v44 = vcombine.low %v215_v33, %v219_v34 }
  0x3c   :  { %v83_v40 = vld [vmem:[#allocation3 + $0xa0] sm:$0xff]  ;;  %3214 = vmatpush1.bf16.msra.mxu0 %v3984_v43 }
  0x3d   :  { %v207_v41 = vld [vmem:[#allocation3 + $0x480] sm:$0xff]  ;;  %v3977_v45 = vcombine.high %v79_v39, %v83_v40  ;;  %3254 = vmatprep.subr.bf16.mxu1 %v4113_v38  ;;  %v3976_v51 = vcombine.low %v79_v39, %v83_v40 }
  0x3e   :  { %v211_v42 = vld [vmem:[#allocation3 + $0x4a0] sm:$0xff]  ;;  %3255 = vmatpush1.bf16.msra.mxu1 %v4112_v44 }
  0x3f   :  { %v4105_v46 = vcombine.high %v207_v41, %v211_v42  ;;  %v71_v47 = vld [vmem:[#allocation3 + $0x40] sm:$0xff]  ;;  %3215 = vmatprep.subr.bf16.mxu0 %v3977_v45  ;;  %v4104_v52 = vcombine.low %v207_v41, %v211_v42 }
  0x40   :  { %v75_v48 = vld [vmem:[#allocation3 + $0x60] sm:$0xff]  ;;  %3216 = vmatpush1.bf16.msra.mxu0 %v3976_v51 }
  0x41   :  { %v199_v49 = vld [vmem:[#allocation3 + $0x440] sm:$0xff]  ;;  %v3969_v53 = vcombine.high %v71_v47, %v75_v48  ;;  %3256 = vmatprep.subr.bf16.mxu1 %v4105_v46  ;;  %v3968_v63 = vcombine.low %v71_v47, %v75_v48 }
  0x42   :  { %v203_v50 = vld [vmem:[#allocation3 + $0x460] sm:$0xff]  ;;  %3257 = vmatpush1.bf16.msra.mxu1 %v4104_v52 }
  0x43   :  { %v4602_v54 = vld [vmem:[%s4742_s0] sm:$0xff]  ;;  %v4607_v55 = vld [vmem:[%s4742_s0 + $0x8] sm:$0xff]  ;;  %v4097_v56 = vcombine.high %v199_v49, %v203_v50  ;;  %3217 = vmatprep.subr.bf16.mxu0 %v3969_v53  ;;  %v4096_v0 = vcombine.low %v199_v49, %v203_v50 }
  0x44   :  { %v63_v57 = vld [vmem:[#allocation3] sm:$0xff]  ;;  %v4611_v59 = vcombine.high %v4602_v54, %v4602_v54  ;;  %v4615_v60 = vcombine.high %v4607_v55, %v4607_v55  ;;  %3218 = vmatpush1.bf16.msra.mxu0 %v3968_v63 }
  0x45   :  { %v67_v58 = vld [vmem:[#allocation3 + $0x20] sm:$0xff]  ;;  %3258 = vmatprep.subr.bf16.mxu1 %v4097_v56 }
  0x46   :  { %v191_v61 = vld [vmem:[#allocation3 + $0x400] sm:$0xff]  ;;  %3237 = vmatprep.mubr.bf16.mxu0 %v4611_v59  ;;  %v3961_v1 = vcombine.high %v63_v57, %v67_v58  ;;  %3278 = vmatprep.mubr.bf16.mxu1 %v4615_v60  ;;  %v3960_v7 = vcombine.low %v63_v57, %v67_v58 }
  0x47   :  { %v195_v62 = vld [vmem:[#allocation3 + $0x420] sm:$0xff]  ;;  %3259 = vmatpush1.bf16.msra.mxu1 %v4096_v0 }
  0x48   :  { %v4089_v2 = vcombine.high %v191_v61, %v195_v62  ;;  %v183_v3 = vld [vmem:[#allocation3 + $0x3c0] sm:$0xff]  ;;  %3219 = vmatprep.subr.bf16.mxu0 %v3961_v1  ;;  %v4088_v8 = vcombine.low %v191_v61, %v195_v62 }
  0x49   :  { %v187_v4 = vld [vmem:[#allocation3 + $0x3e0] sm:$0xff]  ;;  %3220 = vmatpush1.bf16.msra.mxu0 %v3960_v7 }
  0x4a   :  { %v311_v5 = vld [vmem:[#allocation3 + $0x7c0] sm:$0xff]  ;;  %v4081_v9 = vcombine.high %v183_v3, %v187_v4  ;;  %3260 = vmatprep.subr.bf16.mxu1 %v4089_v2  ;;  %v4080_v15 = vcombine.low %v183_v3, %v187_v4 }
  0x4b   :  { %v315_v6 = vld [vmem:[#allocation3 + $0x7e0] sm:$0xff]  ;;  %3261 = vmatpush1.bf16.msra.mxu1 %v4088_v8 }
  0x4c   :  { %v4209_v10 = vcombine.high %v311_v5, %v315_v6  ;;  %v175_v11 = vld [vmem:[#allocation3 + $0x380] sm:$0xff]  ;;  %3221 = vmatprep.subr.bf16.mxu0 %v4081_v9  ;;  %v4208_v16 = vcombine.low %v311_v5, %v315_v6 }
  0x4d   :  { %v179_v12 = vld [vmem:[#allocation3 + $0x3a0] sm:$0xff]  ;;  %3222 = vmatpush2.bf16.msra.mxu0 %v4080_v15 }
  0x4e   :  { %v303_v13 = vld [vmem:[#allocation3 + $0x780] sm:$0xff]  ;;  %v4073_v17 = vcombine.high %v175_v11, %v179_v12  ;;  %3262 = vmatprep.subr.bf16.mxu1 %v4209_v10  ;;  %v4072_v23 = vcombine.low %v175_v11, %v179_v12 }
  0x4f   :  { %v307_v14 = vld [vmem:[#allocation3 + $0x7a0] sm:$0xff]  ;;  %3263 = vmatpush2.bf16.msra.mxu1 %v4208_v16 }
  0x50   :  { %v4201_v18 = vcombine.high %v303_v13, %v307_v14  ;;  %v167_v19 = vld [vmem:[#allocation3 + $0x340] sm:$0xff]  ;;  %3223 = vmatprep.subr.bf16.mxu0 %v4073_v17  ;;  %v4200_v24 = vcombine.low %v303_v13, %v307_v14  ;;  %v4621_v17 = vcombine.low %v4602_v54, %v4602_v54 }
  0x51   :  { %v171_v20 = vld [vmem:[#allocation3 + $0x360] sm:$0xff]  ;;  %3224 = vmatpush2.bf16.msra.mxu0 %v4072_v23  ;;  %v4635_v23 = vld [vmem:[%s4742_s0 + $0x18] sm:$0xff] }
  0x52   :  { %v295_v21 = vld [vmem:[#allocation3 + $0x740] sm:$0xff]  ;;  %v4065_v25 = vcombine.high %v167_v19, %v171_v20  ;;  %3264 = vmatprep.subr.bf16.mxu1 %v4201_v18  ;;  %v4064_v31 = vcombine.low %v167_v19, %v171_v20  ;;  %v4626_v20 = vld [vmem:[%s4742_s0 + $0x10] sm:$0xff] }
  0x53   :  { %v299_v22 = vld [vmem:[#allocation3 + $0x760] sm:$0xff]  ;;  %3265 = vmatpush2.bf16.msra.mxu1 %v4200_v24 }
  0x54   :  { %v4193_v26 = vcombine.high %v295_v21, %v299_v22  ;;  %v159_v27 = vld [vmem:[#allocation3 + $0x300] sm:$0xff]  ;;  %3225 = vmatprep.subr.bf16.mxu0 %v4065_v25  ;;  %v4192_v32 = vcombine.low %v295_v21, %v299_v22  ;;  %v4630_v21 = vcombine.low %v4607_v55, %v4607_v55 }
  0x55   :  { %v163_v28 = vld [vmem:[#allocation3 + $0x320] sm:$0xff]  ;;  %3226 = vmatpush2.bf16.msra.mxu0 %v4064_v31 }
  0x56   :  { %v287_v29 = vld [vmem:[#allocation3 + $0x700] sm:$0xff]  ;;  %v4057_v33 = vcombine.high %v159_v27, %v163_v28  ;;  %3266 = vmatprep.subr.bf16.mxu1 %v4193_v26  ;;  %v4056_v39 = vcombine.low %v159_v27, %v163_v28  ;;  %v4639_v28 = vcombine.high %v4626_v20, %v4626_v20 }
  0x57   :  { %v291_v30 = vld [vmem:[#allocation3 + $0x720] sm:$0xff]  ;;  %3267 = vmatpush2.bf16.msra.mxu1 %v4192_v32 }
  0x58   :  { %v4185_v34 = vcombine.high %v287_v29, %v291_v30  ;;  %v151_v35 = vld [vmem:[#allocation3 + $0x2c0] sm:$0xff]  ;;  %3227 = vmatprep.subr.bf16.mxu0 %v4057_v33  ;;  %v4184_v40 = vcombine.low %v287_v29, %v291_v30  ;;  %v4644_v30 = vcombine.high %v4635_v23, %v4635_v23 }
  0x59   :  { %v155_v36 = vld [vmem:[#allocation3 + $0x2e0] sm:$0xff]  ;;  %3228 = vmatpush2.bf16.msra.mxu0 %v4056_v39 }
  0x5a   :  { %v279_v37 = vld [vmem:[#allocation3 + $0x6c0] sm:$0xff]  ;;  %v4049_v41 = vcombine.high %v151_v35, %v155_v36  ;;  %3268 = vmatprep.subr.bf16.mxu1 %v4185_v34  ;;  %v4048_v47 = vcombine.low %v151_v35, %v155_v36 }
  0x5b   :  { %v283_v38 = vld [vmem:[#allocation3 + $0x6e0] sm:$0xff]  ;;  %3269 = vmatpush2.bf16.msra.mxu1 %v4184_v40 }
  0x5c   :  { %v4177_v42 = vcombine.high %v279_v37, %v283_v38  ;;  %v143_v43 = vld [vmem:[#allocation3 + $0x280] sm:$0xff]  ;;  %3229 = vmatprep.subr.bf16.mxu0 %v4049_v41  ;;  %v4176_v48 = vcombine.low %v279_v37, %v283_v38 }
  0x5d   :  { %v147_v44 = vld [vmem:[#allocation3 + $0x2a0] sm:$0xff]  ;;  %3230 = vmatpush2.bf16.msra.mxu0 %v4048_v47 }
  0x5e   :  { %v271_v45 = vld [vmem:[#allocation3 + $0x680] sm:$0xff]  ;;  %v4041_v49 = vcombine.high %v143_v43, %v147_v44  ;;  %3270 = vmatprep.subr.bf16.mxu1 %v4177_v42  ;;  %v4040_v57 = vcombine.low %v143_v43, %v147_v44 }
  0x5f   :  { %v275_v46 = vld [vmem:[#allocation3 + $0x6a0] sm:$0xff]  ;;  %3271 = vmatpush2.bf16.msra.mxu1 %v4176_v48 }
  0x60   :  { %v4169_v50 = vcombine.high %v271_v45, %v275_v46  ;;  %v135_v51 = vld [vmem:[#allocation3 + $0x240] sm:$0xff]  ;;  %3231 = vmatprep.subr.bf16.mxu0 %v4041_v49  ;;  %v4168_v58 = vcombine.low %v271_v45, %v275_v46 }
  0x61   :  { %v139_v52 = vld [vmem:[#allocation3 + $0x260] sm:$0xff]  ;;  %3232 = vmatpush2.bf16.msra.mxu0 %v4040_v57 }
  0x62   :  { %v263_v53 = vld [vmem:[#allocation3 + $0x640] sm:$0xff]  ;;  %v4033_v61 = vcombine.high %v135_v51, %v139_v52  ;;  %3272 = vmatprep.subr.bf16.mxu1 %v4169_v50  ;;  %v4032_v3 = vcombine.low %v135_v51, %v139_v52 }
  0x63   :  { %v267_v56 = vld [vmem:[#allocation3 + $0x660] sm:$0xff]  ;;  %3273 = vmatpush2.bf16.msra.mxu1 %v4168_v58 }
  0x64   :  { %v4161_v62 = vcombine.high %v263_v53, %v267_v56  ;;  %v127_v63 = vld [vmem:[#allocation3 + $0x200] sm:$0xff]  ;;  %3233 = vmatprep.subr.bf16.mxu0 %v4033_v61  ;;  %v4160_v4 = vcombine.low %v263_v53, %v267_v56 }
  0x65   :  { %v131_v0 = vld [vmem:[#allocation3 + $0x220] sm:$0xff]  ;;  %3234 = vmatpush2.bf16.msra.mxu0 %v4032_v3 }
  0x66   :  { %v255_v1 = vld [vmem:[#allocation3 + $0x600] sm:$0xff]  ;;  %v4025_v5 = vcombine.high %v127_v63, %v131_v0  ;;  %3274 = vmatprep.subr.bf16.mxu1 %v4161_v62  ;;  %v4024_v11 = vcombine.low %v127_v63, %v131_v0 }
  0x67   :  { %v259_v2 = vld [vmem:[#allocation3 + $0x620] sm:$0xff]  ;;  %3275 = vmatpush2.bf16.msra.mxu1 %v4160_v4 }
  0x68   :  { %v4153_v6 = vcombine.high %v255_v1, %v259_v2  ;;  %v375_v7 = vld [vmem:[#allocation3 + $0x9c0] sm:$0xff]  ;;  %3235 = vmatprep.subr.bf16.mxu0 %v4025_v5  ;;  %v4152_v12 = vcombine.low %v255_v1, %v259_v2 }
  0x69   :  { %v379_v8 = vld [vmem:[#allocation3 + $0x9e0] sm:$0xff]  ;;  %3236 = vmatpush2.bf16.msra.mxu0 %v4024_v11 }
  0x6a   :  { %v503_v9 = vld [vmem:[#allocation3 + $0xdc0] sm:$0xff]  ;;  %v4273_v13 = vcombine.high %v375_v7, %v379_v8  ;;  %3276 = vmatprep.subr.bf16.mxu1 %v4153_v6  ;;  %v4272_v22 = vcombine.low %v375_v7, %v379_v8 }
  0x6b   :  { %v507_v10 = vld [vmem:[#allocation3 + $0xde0] sm:$0xff]  ;;  %3277 = vmatpush2.bf16.msra.mxu1 %v4152_v12 }
  0x6c   :  { %v4401_v14 = vcombine.high %v503_v9, %v507_v10  ;;  %v367_v15 = vld [vmem:[#allocation3 + $0x980] sm:$0xff]  ;;  %3287 = vmatprep.subr.bf16.mxu0 %v4273_v13  ;;  %v4400_v54 = vcombine.low %v503_v9, %v507_v10  ;;  %3238 = vmatmul.mubr.bf16.vlgmr.msra.gmra.mxu0 %v4621_v17 }
  0x6d   :  { %v371_v16 = vld [vmem:[#allocation3 + $0x9a0] sm:$0xff]  ;;  %3288 = vmatpush1.bf16.msra.mxu0 %v4272_v22  ;;  %3319 = vmatprep.mubr.bf16.mxu0 %v4639_v28 }
  0x6e   :  { %v495_v18 = vld [vmem:[#allocation3 + $0xd80] sm:$0xff]  ;;  %v4265_v24 = vcombine.high %v367_v15, %v371_v16  ;;  %3328 = vmatprep.subr.bf16.mxu1 %v4401_v14  ;;  %3279 = vmatmul.mubr.bf16.vlgmr.msra.gmra.mxu1 %v4630_v21  ;;  %v4264_v31 = vcombine.low %v367_v15, %v371_v16 }
  0x6f   :  { %v499_v19 = vld [vmem:[#allocation3 + $0xda0] sm:$0xff]  ;;  %3329 = vmatpush1.bf16.msra.mxu1 %v4400_v54  ;;  %3360 = vmatprep.mubr.bf16.mxu1 %v4644_v30 }
  0x70   :  { %v4393_v25 = vcombine.high %v495_v18, %v499_v19  ;;  %v359_v26 = vld [vmem:[#allocation3 + $0x940] sm:$0xff]  ;;  %3289 = vmatprep.subr.bf16.mxu0 %v4265_v24  ;;  %v4392_v32 = vcombine.low %v495_v18, %v499_v19 }
  0x71   :  { %v363_v27 = vld [vmem:[#allocation3 + $0x960] sm:$0xff]  ;;  %3290 = vmatpush1.bf16.msra.mxu0 %v4264_v31 }
  0x72   :  { %v487_v55 = vld [vmem:[#allocation3 + $0xd40] sm:$0xff]  ;;  %v4257_v33 = vcombine.high %v359_v26, %v363_v27  ;;  %3330 = vmatprep.subr.bf16.mxu1 %v4393_v25  ;;  %v4256_v39 = vcombine.low %v359_v26, %v363_v27 }
  0x73   :  { %v491_v29 = vld [vmem:[#allocation3 + $0xd60] sm:$0xff]  ;;  %3331 = vmatpush1.bf16.msra.mxu1 %v4392_v32 }
  0x74   :  { %v4385_v34 = vcombine.high %v487_v55, %v491_v29  ;;  %v351_v35 = vld [vmem:[#allocation3 + $0x900] sm:$0xff]  ;;  %3291 = vmatprep.subr.bf16.mxu0 %v4257_v33  ;;  %v4384_v40 = vcombine.low %v487_v55, %v491_v29 }
  0x75   :  { %v355_v36 = vld [vmem:[#allocation3 + $0x920] sm:$0xff]  ;;  %3292 = vmatpush1.bf16.msra.mxu0 %v4256_v39 }
  0x76   :  { %v479_v37 = vld [vmem:[#allocation3 + $0xd00] sm:$0xff]  ;;  %v4249_v41 = vcombine.high %v351_v35, %v355_v36  ;;  %3332 = vmatprep.subr.bf16.mxu1 %v4385_v34  ;;  %v4248_v47 = vcombine.low %v351_v35, %v355_v36 }
  0x77   :  { %v483_v38 = vld [vmem:[#allocation3 + $0xd20] sm:$0xff]  ;;  %3333 = vmatpush1.bf16.msra.mxu1 %v4384_v40 }
  0x78   :  { %v4377_v42 = vcombine.high %v479_v37, %v483_v38  ;;  %v343_v43 = vld [vmem:[#allocation3 + $0x8c0] sm:$0xff]  ;;  %3293 = vmatprep.subr.bf16.mxu0 %v4249_v41  ;;  %v4376_v48 = vcombine.low %v479_v37, %v483_v38 }
  0x79   :  { %v347_v44 = vld [vmem:[#allocation3 + $0x8e0] sm:$0xff]  ;;  %3294 = vmatpush1.bf16.msra.mxu0 %v4248_v47 }
  0x7a   :  { %v471_v45 = vld [vmem:[#allocation3 + $0xcc0] sm:$0xff]  ;;  %v4241_v49 = vcombine.high %v343_v43, %v347_v44  ;;  %3334 = vmatprep.subr.bf16.mxu1 %v4377_v42  ;;  %v4240_v57 = vcombine.low %v343_v43, %v347_v44 }
  0x7b   :  { %v475_v46 = vld [vmem:[#allocation3 + $0xce0] sm:$0xff]  ;;  %3335 = vmatpush1.bf16.msra.mxu1 %v4376_v48 }
  0x7c   :  { %v4369_v50 = vcombine.high %v471_v45, %v475_v46  ;;  %v335_v51 = vld [vmem:[#allocation3 + $0x880] sm:$0xff]  ;;  %3295 = vmatprep.subr.bf16.mxu0 %v4241_v49  ;;  %v4368_v58 = vcombine.low %v471_v45, %v475_v46 }
  0x7d   :  { %v339_v52 = vld [vmem:[#allocation3 + $0x8a0] sm:$0xff]  ;;  %3296 = vmatpush1.bf16.msra.mxu0 %v4240_v57 }
  0x7e   :  { %v463_v53 = vld [vmem:[#allocation3 + $0xc80] sm:$0xff]  ;;  %v4233_v61 = vcombine.high %v335_v51, %v339_v52  ;;  %3336 = vmatprep.subr.bf16.mxu1 %v4369_v50  ;;  %v4232_v3 = vcombine.low %v335_v51, %v339_v52 }
  0x7f   :  { %v467_v56 = vld [vmem:[#allocation3 + $0xca0] sm:$0xff]  ;;  %3337 = vmatpush1.bf16.msra.mxu1 %v4368_v58 }
  0x80   :  { %v4361_v62 = vcombine.high %v463_v53, %v467_v56  ;;  %v327_v63 = vld [vmem:[#allocation3 + $0x840] sm:$0xff]  ;;  %3297 = vmatprep.subr.bf16.mxu0 %v4233_v61  ;;  %v4360_v4 = vcombine.low %v463_v53, %v467_v56 }
  0x81   :  { %v331_v0 = vld [vmem:[#allocation3 + $0x860] sm:$0xff]  ;;  %3298 = vmatpush1.bf16.msra.mxu0 %v4232_v3 }
  0x82   :  { %v455_v1 = vld [vmem:[#allocation3 + $0xc40] sm:$0xff]  ;;  %v4225_v5 = vcombine.high %v327_v63, %v331_v0  ;;  %3338 = vmatprep.subr.bf16.mxu1 %v4361_v62  ;;  %v4224_v11 = vcombine.low %v327_v63, %v331_v0 }
  0x83   :  { %v459_v2 = vld [vmem:[#allocation3 + $0xc60] sm:$0xff]  ;;  %3339 = vmatpush1.bf16.msra.mxu1 %v4360_v4 }
  0x84   :  { %v4353_v6 = vcombine.high %v455_v1, %v459_v2  ;;  %v319_v7 = vld [vmem:[#allocation3 + $0x800] sm:$0xff]  ;;  %3299 = vmatprep.subr.bf16.mxu0 %v4225_v5  ;;  %v4352_v12 = vcombine.low %v455_v1, %v459_v2 }
  0x85   :  { %v323_v8 = vld [vmem:[#allocation3 + $0x820] sm:$0xff]  ;;  %3300 = vmatpush1.bf16.msra.mxu0 %v4224_v11 }
  0x86   :  { %v447_v9 = vld [vmem:[#allocation3 + $0xc00] sm:$0xff]  ;;  %v4217_v13 = vcombine.high %v319_v7, %v323_v8  ;;  %3340 = vmatprep.subr.bf16.mxu1 %v4353_v6  ;;  %v4216_v22 = vcombine.low %v319_v7, %v323_v8 }
  0x87   :  { %v451_v10 = vld [vmem:[#allocation3 + $0xc20] sm:$0xff]  ;;  %3341 = vmatpush1.bf16.msra.mxu1 %v4352_v12 }
  0x88   :  { %v4345_v14 = vcombine.high %v447_v9, %v451_v10  ;;  %v439_v15 = vld [vmem:[#allocation3 + $0xbc0] sm:$0xff]  ;;  %3301 = vmatprep.subr.bf16.mxu0 %v4217_v13  ;;  %v4344_v54 = vcombine.low %v447_v9, %v451_v10 }
  0x89   :  { %v443_v16 = vld [vmem:[#allocation3 + $0xbe0] sm:$0xff]  ;;  %3302 = vmatpush1.bf16.msra.mxu0 %v4216_v22 }
  0x8a   :  { %v567_v18 = vld [vmem:[#allocation3 + $0xfc0] sm:$0xff]  ;;  %v4337_v24 = vcombine.high %v439_v15, %v443_v16  ;;  %3342 = vmatprep.subr.bf16.mxu1 %v4345_v14  ;;  %v4336_v31 = vcombine.low %v439_v15, %v443_v16 }
  0x8b   :  { %v571_v19 = vld [vmem:[#allocation3 + $0xfe0] sm:$0xff]  ;;  %3343 = vmatpush1.bf16.msra.mxu1 %v4344_v54 }
  0x8c   :  { %v4465_v25 = vcombine.high %v567_v18, %v571_v19  ;;  %v431_v26 = vld [vmem:[#allocation3 + $0xb80] sm:$0xff]  ;;  %3303 = vmatprep.subr.bf16.mxu0 %v4337_v24  ;;  %v4464_v32 = vcombine.low %v567_v18, %v571_v19 }
  0x8d   :  { %v435_v27 = vld [vmem:[#allocation3 + $0xba0] sm:$0xff]  ;;  %3304 = vmatpush2.bf16.msra.mxu0 %v4336_v31 }
  0x8e   :  { %v559_v55 = vld [vmem:[#allocation3 + $0xf80] sm:$0xff]  ;;  %v4329_v33 = vcombine.high %v431_v26, %v435_v27  ;;  %3344 = vmatprep.subr.bf16.mxu1 %v4465_v25  ;;  %v4328_v39 = vcombine.low %v431_v26, %v435_v27  ;;  %v120_v26 = vld [vmem:[#allocation3 + $0x1c8] sm:$0xff] }
  0x8f   :  { %v563_v29 = vld [vmem:[#allocation3 + $0xfa0] sm:$0xff]  ;;  %3345 = vmatpush2.bf16.msra.mxu1 %v4464_v32  ;;  %v124_v27 = vld [vmem:[#allocation3 + $0x1e8] sm:$0xff] }
  0x90   :  { %v4457_v34 = vcombine.high %v559_v55, %v563_v29  ;;  %v423_v35 = vld [vmem:[#allocation3 + $0xb40] sm:$0xff]  ;;  %3305 = vmatprep.subr.bf16.mxu0 %v4329_v33  ;;  %v4456_v40 = vcombine.low %v559_v55, %v563_v29  ;;  %v248_v55 = vld [vmem:[#allocation3 + $0x5c8] sm:$0xff]  ;;  %v4019_v33 = vcombine.high %v120_v26, %v124_v27 }
  0x91   :  { %v427_v36 = vld [vmem:[#allocation3 + $0xb60] sm:$0xff]  ;;  %3306 = vmatpush2.bf16.msra.mxu0 %v4328_v39  ;;  %v252_v29 = vld [vmem:[#allocation3 + $0x5e8] sm:$0xff] }
  0x92   :  { %v551_v37 = vld [vmem:[#allocation3 + $0xf40] sm:$0xff]  ;;  %v4321_v41 = vcombine.high %v423_v35, %v427_v36  ;;  %3346 = vmatprep.subr.bf16.mxu1 %v4457_v34  ;;  %v4320_v47 = vcombine.low %v423_v35, %v427_v36  ;;  %v4147_v34 = vcombine.high %v248_v55, %v252_v29  ;;  %v112_v35 = vld [vmem:[#allocation3 + $0x188] sm:$0xff] }
  0x93   :  { %v555_v38 = vld [vmem:[#allocation3 + $0xf60] sm:$0xff]  ;;  %3347 = vmatpush2.bf16.msra.mxu1 %v4456_v40  ;;  %v116_v36 = vld [vmem:[#allocation3 + $0x1a8] sm:$0xff]  ;;  %v4655_v40 = vcombine.low %v4635_v23, %v4635_v23 }
  0x94   :  { %v4449_v42 = vcombine.high %v551_v37, %v555_v38  ;;  %v415_v43 = vld [vmem:[#allocation3 + $0xb00] sm:$0xff]  ;;  %3307 = vmatprep.subr.bf16.mxu0 %v4321_v41  ;;  %v4448_v48 = vcombine.low %v551_v37, %v555_v38  ;;  %v4651_v37 = vcombine.low %v4626_v20, %v4626_v20  ;;  %v240_v38 = vld [vmem:[#allocation3 + $0x588] sm:$0xff]  ;;  %v4018_v41 = vcombine.low %v120_v26, %v124_v27 }
  0x95   :  { %v419_v44 = vld [vmem:[#allocation3 + $0xb20] sm:$0xff]  ;;  %3308 = vmatpush2.bf16.msra.mxu0 %v4320_v47  ;;  %v244_v39 = vld [vmem:[#allocation3 + $0x5a8] sm:$0xff] }
  0x96   :  { %v543_v45 = vld [vmem:[#allocation3 + $0xf00] sm:$0xff]  ;;  %v4313_v49 = vcombine.high %v415_v43, %v419_v44  ;;  %3348 = vmatprep.subr.bf16.mxu1 %v4449_v42  ;;  %v4312_v57 = vcombine.low %v415_v43, %v419_v44  ;;  %v4146_v42 = vcombine.low %v248_v55, %v252_v29  ;;  %v4011_v43 = vcombine.high %v112_v35, %v116_v36  ;;  %v232_v20 = vld [vmem:[#allocation3 + $0x548] sm:$0xff] }
  0x97   :  { %v547_v46 = vld [vmem:[#allocation3 + $0xf20] sm:$0xff]  ;;  %3349 = vmatpush2.bf16.msra.mxu1 %v4448_v48  ;;  %v4139_v44 = vcombine.high %v240_v38, %v244_v39  ;;  %v236_v47 = vld [vmem:[#allocation3 + $0x568] sm:$0xff]  ;;  %v4010_v48 = vcombine.low %v112_v35, %v116_v36  ;;  %v4138_v23 = vcombine.low %v240_v38, %v244_v39 }
  0x98   :  { %v4441_v50 = vcombine.high %v543_v45, %v547_v46  ;;  %v407_v51 = vld [vmem:[#allocation3 + $0xac0] sm:$0xff]  ;;  %3309 = vmatprep.subr.bf16.mxu0 %v4313_v49  ;;  %v4440_v58 = vcombine.low %v543_v45, %v547_v46  ;;  %v104_v45 = vld [vmem:[#allocation3 + $0x148] sm:$0xff] }
  0x99   :  { %v411_v52 = vld [vmem:[#allocation3 + $0xae0] sm:$0xff]  ;;  %3310 = vmatpush2.bf16.msra.mxu0 %v4312_v57  ;;  %v108_v46 = vld [vmem:[#allocation3 + $0x168] sm:$0xff] }
  0x9a   :  { %v535_v53 = vld [vmem:[#allocation3 + $0xec0] sm:$0xff]  ;;  %v4305_v61 = vcombine.high %v407_v51, %v411_v52  ;;  %3350 = vmatprep.subr.bf16.mxu1 %v4441_v50  ;;  %v4304_v3 = vcombine.low %v407_v51, %v411_v52  ;;  %v4003_v49 = vcombine.high %v104_v45, %v108_v46  ;;  %v4131_v50 = vcombine.high %v232_v20, %v236_v47  ;;  %v96_v51 = vld [vmem:[#allocation3 + $0x108] sm:$0xff] }
  0x9b   :  { %v539_v56 = vld [vmem:[#allocation3 + $0xee0] sm:$0xff]  ;;  %3351 = vmatpush2.bf16.msra.mxu1 %v4440_v58  ;;  %v100_v52 = vld [vmem:[#allocation3 + $0x128] sm:$0xff]  ;;  %v4002_v57 = vcombine.low %v104_v45, %v108_v46  ;;  %v4130_v58 = vcombine.low %v232_v20, %v236_v47 }
  0x9c   :  { %v4433_v62 = vcombine.high %v535_v53, %v539_v56  ;;  %v399_v63 = vld [vmem:[#allocation3 + $0xa80] sm:$0xff]  ;;  %3311 = vmatprep.subr.bf16.mxu0 %v4305_v61  ;;  %v4432_v4 = vcombine.low %v535_v53, %v539_v56  ;;  %v224_v53 = vld [vmem:[#allocation3 + $0x508] sm:$0xff]  ;;  %v3995_v61 = vcombine.high %v96_v51, %v100_v52 }
  0x9d   :  { %v403_v0 = vld [vmem:[#allocation3 + $0xaa0] sm:$0xff]  ;;  %3312 = vmatpush2.bf16.msra.mxu0 %v4304_v3  ;;  %v228_v56 = vld [vmem:[#allocation3 + $0x528] sm:$0xff]  ;;  %v3994_v3 = vcombine.low %v96_v51, %v100_v52 }
  0x9e   :  { %v527_v1 = vld [vmem:[#allocation3 + $0xe80] sm:$0xff]  ;;  %v4297_v5 = vcombine.high %v399_v63, %v403_v0  ;;  %3352 = vmatprep.subr.bf16.mxu1 %v4433_v62  ;;  %v4296_v11 = vcombine.low %v399_v63, %v403_v0  ;;  %v4123_v62 = vcombine.high %v224_v53, %v228_v56  ;;  %v88_v63 = vld [vmem:[#allocation3 + $0xc8] sm:$0xff] }
  0x9f   :  { %v531_v2 = vld [vmem:[#allocation3 + $0xea0] sm:$0xff]  ;;  %3353 = vmatpush2.bf16.msra.mxu1 %v4432_v4  ;;  %v92_v0 = vld [vmem:[#allocation3 + $0xe8] sm:$0xff]  ;;  %v4122_v4 = vcombine.low %v224_v53, %v228_v56 }
  0xa0   :  { %v4425_v6 = vcombine.high %v527_v1, %v531_v2  ;;  %v391_v7 = vld [vmem:[#allocation3 + $0xa40] sm:$0xff]  ;;  %3313 = vmatprep.subr.bf16.mxu0 %v4297_v5  ;;  %v4424_v12 = vcombine.low %v527_v1, %v531_v2  ;;  %v216_v1 = vld [vmem:[#allocation3 + $0x4c8] sm:$0xff]  ;;  %v3987_v5 = vcombine.high %v88_v63, %v92_v0 }
  0xa1   :  { %v395_v8 = vld [vmem:[#allocation3 + $0xa60] sm:$0xff]  ;;  %3314 = vmatpush2.bf16.msra.mxu0 %v4296_v11  ;;  %v220_v2 = vld [vmem:[#allocation3 + $0x4e8] sm:$0xff]  ;;  %v3986_v11 = vcombine.low %v88_v63, %v92_v0 }
  0xa2   :  { %v519_v9 = vld [vmem:[#allocation3 + $0xe40] sm:$0xff]  ;;  %v4289_v13 = vcombine.high %v391_v7, %v395_v8  ;;  %3354 = vmatprep.subr.bf16.mxu1 %v4425_v6  ;;  %v4288_v22 = vcombine.low %v391_v7, %v395_v8  ;;  %v4115_v6 = vcombine.high %v216_v1, %v220_v2  ;;  %v80_v7 = vld [vmem:[#allocation3 + $0x88] sm:$0xff] }
  0xa3   :  { %v523_v10 = vld [vmem:[#allocation3 + $0xe60] sm:$0xff]  ;;  %3355 = vmatpush2.bf16.msra.mxu1 %v4424_v12  ;;  %v84_v8 = vld [vmem:[#allocation3 + $0xa8] sm:$0xff]  ;;  %v4114_v12 = vcombine.low %v216_v1, %v220_v2 }
  0xa4   :  { %v4417_v14 = vcombine.high %v519_v9, %v523_v10  ;;  %v383_v15 = vld [vmem:[#allocation3 + $0xa00] sm:$0xff]  ;;  %3315 = vmatprep.subr.bf16.mxu0 %v4289_v13  ;;  %v4416_v54 = vcombine.low %v519_v9, %v523_v10  ;;  %v208_v9 = vld [vmem:[#allocation3 + $0x488] sm:$0xff]  ;;  %v3979_v13 = vcombine.high %v80_v7, %v84_v8 }
  0xa5   :  { %v387_v16 = vld [vmem:[#allocation3 + $0xa20] sm:$0xff]  ;;  %3316 = vmatpush2.bf16.msra.mxu0 %v4288_v22  ;;  %v212_v10 = vld [vmem:[#allocation3 + $0x4a8] sm:$0xff]  ;;  %v3978_v22 = vcombine.low %v80_v7, %v84_v8 }
  0xa6   :  { %v511_v18 = vld [vmem:[#allocation3 + $0xe00] sm:$0xff]  ;;  %v4281_v24 = vcombine.high %v383_v15, %v387_v16  ;;  %3356 = vmatprep.subr.bf16.mxu1 %v4417_v14  ;;  %v4280_v31 = vcombine.low %v383_v15, %v387_v16  ;;  %v4107_v14 = vcombine.high %v208_v9, %v212_v10  ;;  %v72_v15 = vld [vmem:[#allocation3 + $0x48] sm:$0xff] }
  0xa7   :  { %v515_v19 = vld [vmem:[#allocation3 + $0xe20] sm:$0xff]  ;;  %3357 = vmatpush2.bf16.msra.mxu1 %v4416_v54  ;;  %v76_v16 = vld [vmem:[#allocation3 + $0x68] sm:$0xff]  ;;  %v4106_v54 = vcombine.low %v208_v9, %v212_v10 }
  0xa8   :  { %v4409_v25 = vcombine.high %v511_v18, %v515_v19  ;;  %3317 = vmatprep.subr.bf16.mxu0 %v4281_v24  ;;  %v4408_v32 = vcombine.low %v511_v18, %v515_v19  ;;  %v200_v18 = vld [vmem:[#allocation3 + $0x448] sm:$0xff]  ;;  %v3971_v24 = vcombine.high %v72_v15, %v76_v16 }
  0xa9   :  { %3318 = vmatpush2.bf16.msra.mxu0 %v4280_v31  ;;  %v204_v19 = vld [vmem:[#allocation3 + $0x468] sm:$0xff]  ;;  %v3970_v31 = vcombine.low %v72_v15, %v76_v16 }
  0xaa   :  { %3358 = vmatprep.subr.bf16.mxu1 %v4409_v25  ;;  %3369 = vmatprep.subr.bf16.mxu0 %v4019_v33  ;;  %v4099_v25 = vcombine.high %v200_v18, %v204_v19  ;;  %v64_v26 = vld [vmem:[#allocation3 + $0x8] sm:$0xff] }
  0xab   :  { %3359 = vmatpush2.bf16.msra.mxu1 %v4408_v32  ;;  %v68_v27 = vld [vmem:[#allocation3 + $0x28] sm:$0xff]  ;;  %v4098_v32 = vcombine.low %v200_v18, %v204_v19 }
  0xac   :  { %3410 = vmatprep.subr.bf16.mxu1 %v4147_v34  ;;  %3320 = vmatmul.mubr.bf16.vlgmr.msra.gmra.mxu0 %v4651_v37  ;;  %v192_v55 = vld [vmem:[#allocation3 + $0x408] sm:$0xff]  ;;  %v3963_v33 = vcombine.high %v64_v26, %v68_v27 }
  0xad   :  { %3370 = vmatpush1.bf16.msra.mxu0 %v4018_v41  ;;  %3401 = vmatprep.mubr.bf16.mxu0 %v4611_v59  ;;  %v196_v29 = vld [vmem:[#allocation3 + $0x428] sm:$0xff]  ;;  %v3962_v41 = vcombine.low %v64_v26, %v68_v27 }
  0xae   :  { %3361 = vmatmul.mubr.bf16.vlgmr.msra.gmra.mxu1 %v4655_v40  ;;  %3371 = vmatprep.subr.bf16.mxu0 %v4011_v43  ;;  %v4091_v34 = vcombine.high %v192_v55, %v196_v29  ;;  %v184_v35 = vld [vmem:[#allocation3 + $0x3c8] sm:$0xff] }
  0xaf   :  { %3411 = vmatpush1.bf16.msra.mxu1 %v4146_v42  ;;  %3442 = vmatprep.mubr.bf16.mxu1 %v4615_v60  ;;  %v188_v36 = vld [vmem:[#allocation3 + $0x3e8] sm:$0xff]  ;;  %v4090_v42 = vcombine.low %v192_v55, %v196_v29 }
  0xb0   :  { %3412 = vmatprep.subr.bf16.mxu1 %v4139_v44  ;;  %v312_v38 = vld [vmem:[#allocation3 + $0x7c8] sm:$0xff]  ;;  %v4083_v43 = vcombine.high %v184_v35, %v188_v36 }
  0xb1   :  { %3372 = vmatpush1.bf16.msra.mxu0 %v4010_v48  ;;  %v316_v39 = vld [vmem:[#allocation3 + $0x7e8] sm:$0xff]  ;;  %v4082_v48 = vcombine.low %v184_v35, %v188_v36 }
  0xb2   :  { %3373 = vmatprep.subr.bf16.mxu0 %v4003_v49  ;;  %v4211_v44 = vcombine.high %v312_v38, %v316_v39  ;;  %v176_v45 = vld [vmem:[#allocation3 + $0x388] sm:$0xff] }
  0xb3   :  { %3413 = vmatpush1.bf16.msra.mxu1 %v4138_v23  ;;  %v180_v46 = vld [vmem:[#allocation3 + $0x3a8] sm:$0xff]  ;;  %v4210_v23 = vcombine.low %v312_v38, %v316_v39 }
  0xb4   :  { %3414 = vmatprep.subr.bf16.mxu1 %v4131_v50  ;;  %v304_v20 = vld [vmem:[#allocation3 + $0x788] sm:$0xff]  ;;  %v4075_v49 = vcombine.high %v176_v45, %v180_v46 }
  0xb5   :  { %3374 = vmatpush1.bf16.msra.mxu0 %v4002_v57  ;;  %v308_v47 = vld [vmem:[#allocation3 + $0x7a8] sm:$0xff]  ;;  %v4074_v57 = vcombine.low %v176_v45, %v180_v46 }
  0xb6   :  { %3375 = vmatprep.subr.bf16.mxu0 %v3995_v61  ;;  %v4203_v50 = vcombine.high %v304_v20, %v308_v47  ;;  %v168_v51 = vld [vmem:[#allocation3 + $0x348] sm:$0xff] }
  0xb7   :  { %3415 = vmatpush1.bf16.msra.mxu1 %v4130_v58  ;;  %v172_v52 = vld [vmem:[#allocation3 + $0x368] sm:$0xff]  ;;  %v4202_v58 = vcombine.low %v304_v20, %v308_v47 }
  0xb8   :  { %3416 = vmatprep.subr.bf16.mxu1 %v4123_v62  ;;  %v296_v53 = vld [vmem:[#allocation3 + $0x748] sm:$0xff]  ;;  %v4067_v61 = vcombine.high %v168_v51, %v172_v52 }
  0xb9   :  { %3376 = vmatpush1.bf16.msra.mxu0 %v3994_v3  ;;  %v300_v56 = vld [vmem:[#allocation3 + $0x768] sm:$0xff]  ;;  %v4066_v3 = vcombine.low %v168_v51, %v172_v52 }
  0xba   :  { %3377 = vmatprep.subr.bf16.mxu0 %v3987_v5  ;;  %v4195_v62 = vcombine.high %v296_v53, %v300_v56  ;;  %v160_v63 = vld [vmem:[#allocation3 + $0x308] sm:$0xff] }
  0xbb   :  { %3417 = vmatpush1.bf16.msra.mxu1 %v4122_v4  ;;  %v164_v0 = vld [vmem:[#allocation3 + $0x328] sm:$0xff]  ;;  %v4194_v4 = vcombine.low %v296_v53, %v300_v56 }
  0xbc   :  { %3418 = vmatprep.subr.bf16.mxu1 %v4115_v6  ;;  %v288_v1 = vld [vmem:[#allocation3 + $0x708] sm:$0xff]  ;;  %v4059_v5 = vcombine.high %v160_v63, %v164_v0 }
  0xbd   :  { %3378 = vmatpush1.bf16.msra.mxu0 %v3986_v11  ;;  %v292_v2 = vld [vmem:[#allocation3 + $0x728] sm:$0xff]  ;;  %v4058_v11 = vcombine.low %v160_v63, %v164_v0 }
  0xbe   :  { %3379 = vmatprep.subr.bf16.mxu0 %v3979_v13  ;;  %v4187_v6 = vcombine.high %v288_v1, %v292_v2  ;;  %v152_v7 = vld [vmem:[#allocation3 + $0x2c8] sm:$0xff] }
  0xbf   :  { %3419 = vmatpush1.bf16.msra.mxu1 %v4114_v12  ;;  %v156_v8 = vld [vmem:[#allocation3 + $0x2e8] sm:$0xff]  ;;  %v4186_v12 = vcombine.low %v288_v1, %v292_v2 }
  0xc0   :  { %3420 = vmatprep.subr.bf16.mxu1 %v4107_v14  ;;  %v280_v9 = vld [vmem:[#allocation3 + $0x6c8] sm:$0xff]  ;;  %v4051_v13 = vcombine.high %v152_v7, %v156_v8 }
  0xc1   :  { %3380 = vmatpush1.bf16.msra.mxu0 %v3978_v22  ;;  %v284_v10 = vld [vmem:[#allocation3 + $0x6e8] sm:$0xff]  ;;  %v4050_v22 = vcombine.low %v152_v7, %v156_v8 }
  0xc2   :  { %3381 = vmatprep.subr.bf16.mxu0 %v3971_v24  ;;  %v4179_v14 = vcombine.high %v280_v9, %v284_v10  ;;  %v144_v15 = vld [vmem:[#allocation3 + $0x288] sm:$0xff] }
  0xc3   :  { %3421 = vmatpush1.bf16.msra.mxu1 %v4106_v54  ;;  %v148_v16 = vld [vmem:[#allocation3 + $0x2a8] sm:$0xff]  ;;  %v4178_v54 = vcombine.low %v280_v9, %v284_v10 }
  0xc4   :  { %3422 = vmatprep.subr.bf16.mxu1 %v4099_v25  ;;  %v272_v18 = vld [vmem:[#allocation3 + $0x688] sm:$0xff]  ;;  %v4043_v24 = vcombine.high %v144_v15, %v148_v16 }
  0xc5   :  { %3382 = vmatpush1.bf16.msra.mxu0 %v3970_v31  ;;  %v276_v19 = vld [vmem:[#allocation3 + $0x6a8] sm:$0xff]  ;;  %v4042_v31 = vcombine.low %v144_v15, %v148_v16 }
  0xc6   :  { %3383 = vmatprep.subr.bf16.mxu0 %v3963_v33  ;;  %v4171_v25 = vcombine.high %v272_v18, %v276_v19  ;;  %v136_v26 = vld [vmem:[#allocation3 + $0x248] sm:$0xff] }
  0xc7   :  { %3423 = vmatpush1.bf16.msra.mxu1 %v4098_v32  ;;  %v140_v27 = vld [vmem:[#allocation3 + $0x268] sm:$0xff]  ;;  %v4170_v32 = vcombine.low %v272_v18, %v276_v19 }
  0xc8   :  { %3424 = vmatprep.subr.bf16.mxu1 %v4091_v34  ;;  %v264_v55 = vld [vmem:[#allocation3 + $0x648] sm:$0xff]  ;;  %v4035_v33 = vcombine.high %v136_v26, %v140_v27 }
  0xc9   :  { %3384 = vmatpush1.bf16.msra.mxu0 %v3962_v41  ;;  %v268_v29 = vld [vmem:[#allocation3 + $0x668] sm:$0xff]  ;;  %v4034_v41 = vcombine.low %v136_v26, %v140_v27 }
  0xca   :  { %3385 = vmatprep.subr.bf16.mxu0 %v4083_v43  ;;  %v4163_v34 = vcombine.high %v264_v55, %v268_v29  ;;  %v128_v35 = vld [vmem:[#allocation3 + $0x208] sm:$0xff] }
  0xcb   :  { %3425 = vmatpush1.bf16.msra.mxu1 %v4090_v42  ;;  %v132_v36 = vld [vmem:[#allocation3 + $0x228] sm:$0xff]  ;;  %v4162_v42 = vcombine.low %v264_v55, %v268_v29 }
  0xcc   :  { %3426 = vmatprep.subr.bf16.mxu1 %v4211_v44  ;;  %v256_v38 = vld [vmem:[#allocation3 + $0x608] sm:$0xff]  ;;  %v4027_v43 = vcombine.high %v128_v35, %v132_v36 }
  0xcd   :  { %3386 = vmatpush2.bf16.msra.mxu0 %v4082_v48  ;;  %v260_v39 = vld [vmem:[#allocation3 + $0x628] sm:$0xff]  ;;  %v4026_v48 = vcombine.low %v128_v35, %v132_v36 }
  0xce   :  { %3387 = vmatprep.subr.bf16.mxu0 %v4075_v49  ;;  %v4155_v44 = vcombine.high %v256_v38, %v260_v39  ;;  %v376_v45 = vld [vmem:[#allocation3 + $0x9c8] sm:$0xff] }
  0xcf   :  { %3427 = vmatpush2.bf16.msra.mxu1 %v4210_v23  ;;  %v380_v46 = vld [vmem:[#allocation3 + $0x9e8] sm:$0xff]  ;;  %v4154_v23 = vcombine.low %v256_v38, %v260_v39 }
  0xd0   :  { %3428 = vmatprep.subr.bf16.mxu1 %v4203_v50  ;;  %v504_v20 = vld [vmem:[#allocation3 + $0xdc8] sm:$0xff]  ;;  %v4275_v49 = vcombine.high %v376_v45, %v380_v46 }
  0xd1   :  { %3388 = vmatpush2.bf16.msra.mxu0 %v4074_v57  ;;  %v508_v47 = vld [vmem:[#allocation3 + $0xde8] sm:$0xff]  ;;  %v4274_v57 = vcombine.low %v376_v45, %v380_v46 }
  0xd2   :  { %3389 = vmatprep.subr.bf16.mxu0 %v4067_v61  ;;  %v4403_v50 = vcombine.high %v504_v20, %v508_v47  ;;  %v368_v51 = vld [vmem:[#allocation3 + $0x988] sm:$0xff] }
  0xd3   :  { %3429 = vmatpush2.bf16.msra.mxu1 %v4202_v58  ;;  %v372_v52 = vld [vmem:[#allocation3 + $0x9a8] sm:$0xff]  ;;  %v4402_v58 = vcombine.low %v504_v20, %v508_v47 }
  0xd4   :  { %3430 = vmatprep.subr.bf16.mxu1 %v4195_v62  ;;  %v496_v53 = vld [vmem:[#allocation3 + $0xd88] sm:$0xff]  ;;  %v4267_v61 = vcombine.high %v368_v51, %v372_v52 }
  0xd5   :  { %3390 = vmatpush2.bf16.msra.mxu0 %v4066_v3  ;;  %v500_v56 = vld [vmem:[#allocation3 + $0xda8] sm:$0xff]  ;;  %v4266_v3 = vcombine.low %v368_v51, %v372_v52 }
  0xd6   :  { %3391 = vmatprep.subr.bf16.mxu0 %v4059_v5  ;;  %v4395_v62 = vcombine.high %v496_v53, %v500_v56  ;;  %v360_v63 = vld [vmem:[#allocation3 + $0x948] sm:$0xff] }
  0xd7   :  { %3431 = vmatpush2.bf16.msra.mxu1 %v4194_v4  ;;  %v364_v0 = vld [vmem:[#allocation3 + $0x968] sm:$0xff]  ;;  %v4394_v4 = vcombine.low %v496_v53, %v500_v56 }
  0xd8   :  { %3432 = vmatprep.subr.bf16.mxu1 %v4187_v6  ;;  %v488_v1 = vld [vmem:[#allocation3 + $0xd48] sm:$0xff]  ;;  %v4259_v5 = vcombine.high %v360_v63, %v364_v0 }
  0xd9   :  { %3392 = vmatpush2.bf16.msra.mxu0 %v4058_v11  ;;  %v492_v2 = vld [vmem:[#allocation3 + $0xd68] sm:$0xff]  ;;  %v4258_v11 = vcombine.low %v360_v63, %v364_v0 }
  0xda   :  { %3393 = vmatprep.subr.bf16.mxu0 %v4051_v13  ;;  %v4387_v6 = vcombine.high %v488_v1, %v492_v2  ;;  %v352_v7 = vld [vmem:[#allocation3 + $0x908] sm:$0xff] }
  0xdb   :  { %3433 = vmatpush2.bf16.msra.mxu1 %v4186_v12  ;;  %v356_v8 = vld [vmem:[#allocation3 + $0x928] sm:$0xff]  ;;  %v4386_v12 = vcombine.low %v488_v1, %v492_v2 }
  0xdc   :  { %3434 = vmatprep.subr.bf16.mxu1 %v4179_v14  ;;  %v480_v9 = vld [vmem:[#allocation3 + $0xd08] sm:$0xff]  ;;  %v4251_v13 = vcombine.high %v352_v7, %v356_v8 }
  0xdd   :  { %3394 = vmatpush2.bf16.msra.mxu0 %v4050_v22  ;;  %v484_v10 = vld [vmem:[#allocation3 + $0xd28] sm:$0xff]  ;;  %v4250_v22 = vcombine.low %v352_v7, %v356_v8 }
  0xde   :  { %3395 = vmatprep.subr.bf16.mxu0 %v4043_v24  ;;  %v4379_v14 = vcombine.high %v480_v9, %v484_v10  ;;  %v344_v15 = vld [vmem:[#allocation3 + $0x8c8] sm:$0xff] }
  0xdf   :  { %3435 = vmatpush2.bf16.msra.mxu1 %v4178_v54  ;;  %v348_v16 = vld [vmem:[#allocation3 + $0x8e8] sm:$0xff]  ;;  %v4378_v54 = vcombine.low %v480_v9, %v484_v10 }
  0xe0   :  { %3436 = vmatprep.subr.bf16.mxu1 %v4171_v25  ;;  %v472_v18 = vld [vmem:[#allocation3 + $0xcc8] sm:$0xff]  ;;  %v4243_v24 = vcombine.high %v344_v15, %v348_v16 }
  0xe1   :  { %3396 = vmatpush2.bf16.msra.mxu0 %v4042_v31  ;;  %v476_v19 = vld [vmem:[#allocation3 + $0xce8] sm:$0xff]  ;;  %v4242_v31 = vcombine.low %v344_v15, %v348_v16 }
  0xe2   :  { %3397 = vmatprep.subr.bf16.mxu0 %v4035_v33  ;;  %v4371_v25 = vcombine.high %v472_v18, %v476_v19  ;;  %v336_v26 = vld [vmem:[#allocation3 + $0x888] sm:$0xff] }
  0xe3   :  { %3437 = vmatpush2.bf16.msra.mxu1 %v4170_v32  ;;  %v340_v27 = vld [vmem:[#allocation3 + $0x8a8] sm:$0xff]  ;;  %v4370_v32 = vcombine.low %v472_v18, %v476_v19 }
  0xe4   :  { %3438 = vmatprep.subr.bf16.mxu1 %v4163_v34  ;;  %v464_v55 = vld [vmem:[#allocation3 + $0xc88] sm:$0xff]  ;;  %v4235_v33 = vcombine.high %v336_v26, %v340_v27 }
  0xe5   :  { %3398 = vmatpush2.bf16.msra.mxu0 %v4034_v41  ;;  %v468_v29 = vld [vmem:[#allocation3 + $0xca8] sm:$0xff]  ;;  %v4234_v41 = vcombine.low %v336_v26, %v340_v27 }
  0xe6   :  { %3399 = vmatprep.subr.bf16.mxu0 %v4027_v43  ;;  %v4363_v34 = vcombine.high %v464_v55, %v468_v29  ;;  %v328_v35 = vld [vmem:[#allocation3 + $0x848] sm:$0xff] }
  0xe7   :  { %3439 = vmatpush2.bf16.msra.mxu1 %v4162_v42  ;;  %v332_v36 = vld [vmem:[#allocation3 + $0x868] sm:$0xff]  ;;  %v4362_v42 = vcombine.low %v464_v55, %v468_v29 }
  0xe8   :  { %3440 = vmatprep.subr.bf16.mxu1 %v4155_v44  ;;  %v456_v38 = vld [vmem:[#allocation3 + $0xc48] sm:$0xff]  ;;  %v4227_v43 = vcombine.high %v328_v35, %v332_v36 }
  0xe9   :  { %3400 = vmatpush2.bf16.msra.mxu0 %v4026_v48  ;;  %v460_v39 = vld [vmem:[#allocation3 + $0xc68] sm:$0xff]  ;;  %v4226_v48 = vcombine.low %v328_v35, %v332_v36 }
  0xea   :  { %3451 = vmatprep.subr.bf16.mxu0 %v4275_v49  ;;  %v4355_v44 = vcombine.high %v456_v38, %v460_v39  ;;  %v320_v45 = vld [vmem:[#allocation3 + $0x808] sm:$0xff] }
  0xeb   :  { %3441 = vmatpush2.bf16.msra.mxu1 %v4154_v23  ;;  %v324_v46 = vld [vmem:[#allocation3 + $0x828] sm:$0xff]  ;;  %v4354_v23 = vcombine.low %v456_v38, %v460_v39 }
  0xec   :  { %3492 = vmatprep.subr.bf16.mxu1 %v4403_v50  ;;  %3402 = vmatmul.mubr.bf16.vlgmr.msra.gmra.mxu0 %v4621_v17  ;;  %v448_v20 = vld [vmem:[#allocation3 + $0xc08] sm:$0xff]  ;;  %v4219_v49 = vcombine.high %v320_v45, %v324_v46 }
  0xed   :  { %3452 = vmatpush1.bf16.msra.mxu0 %v4274_v57  ;;  %3483 = vmatprep.mubr.bf16.mxu0 %v4639_v28  ;;  %v452_v47 = vld [vmem:[#allocation3 + $0xc28] sm:$0xff]  ;;  %v4218_v57 = vcombine.low %v320_v45, %v324_v46 }
  0xee   :  { %3443 = vmatmul.mubr.bf16.vlgmr.msra.gmra.mxu1 %v4630_v21  ;;  %3453 = vmatprep.subr.bf16.mxu0 %v4267_v61  ;;  %v4347_v50 = vcombine.high %v448_v20, %v452_v47  ;;  %v440_v51 = vld [vmem:[#allocation3 + $0xbc8] sm:$0xff] }
  0xef   :  { %3493 = vmatpush1.bf16.msra.mxu1 %v4402_v58  ;;  %3524 = vmatprep.mubr.bf16.mxu1 %v4644_v30  ;;  %v444_v52 = vld [vmem:[#allocation3 + $0xbe8] sm:$0xff]  ;;  %v4346_v58 = vcombine.low %v448_v20, %v452_v47 }
  0xf0   :  { %3494 = vmatprep.subr.bf16.mxu1 %v4395_v62  ;;  %v568_v53 = vld [vmem:[#allocation3 + $0xfc8] sm:$0xff]  ;;  %v4339_v61 = vcombine.high %v440_v51, %v444_v52 }
  0xf1   :  { %3454 = vmatpush1.bf16.msra.mxu0 %v4266_v3  ;;  %v572_v56 = vld [vmem:[#allocation3 + $0xfe8] sm:$0xff]  ;;  %v4338_v3 = vcombine.low %v440_v51, %v444_v52 }
  0xf2   :  { %3455 = vmatprep.subr.bf16.mxu0 %v4259_v5  ;;  %v4467_v62 = vcombine.high %v568_v53, %v572_v56  ;;  %v432_v63 = vld [vmem:[#allocation3 + $0xb88] sm:$0xff] }
  0xf3   :  { %3495 = vmatpush1.bf16.msra.mxu1 %v4394_v4  ;;  %v436_v0 = vld [vmem:[#allocation3 + $0xba8] sm:$0xff]  ;;  %v4466_v4 = vcombine.low %v568_v53, %v572_v56 }
  0xf4   :  { %3496 = vmatprep.subr.bf16.mxu1 %v4387_v6  ;;  %v560_v1 = vld [vmem:[#allocation3 + $0xf88] sm:$0xff]  ;;  %v4331_v5 = vcombine.high %v432_v63, %v436_v0 }
  0xf5   :  { %3456 = vmatpush1.bf16.msra.mxu0 %v4258_v11  ;;  %v564_v2 = vld [vmem:[#allocation3 + $0xfa8] sm:$0xff]  ;;  %v4330_v11 = vcombine.low %v432_v63, %v436_v0 }
  0xf6   :  { %3457 = vmatprep.subr.bf16.mxu0 %v4251_v13  ;;  %v4459_v6 = vcombine.high %v560_v1, %v564_v2  ;;  %v424_v7 = vld [vmem:[#allocation3 + $0xb48] sm:$0xff] }
  0xf7   :  { %3497 = vmatpush1.bf16.msra.mxu1 %v4386_v12  ;;  %v428_v8 = vld [vmem:[#allocation3 + $0xb68] sm:$0xff]  ;;  %v4458_v12 = vcombine.low %v560_v1, %v564_v2  ;;  %v121_v1 = vld [vmem:[#allocation3 + $0x1d0] sm:$0xff] }
  0xf8   :  { %3498 = vmatprep.subr.bf16.mxu1 %v4379_v14  ;;  %v552_v9 = vld [vmem:[#allocation3 + $0xf48] sm:$0xff]  ;;  %v4323_v13 = vcombine.high %v424_v7, %v428_v8  ;;  %v125_v2 = vld [vmem:[#allocation3 + $0x1f0] sm:$0xff] }
  0xf9   :  { %3458 = vmatpush1.bf16.msra.mxu0 %v4250_v22  ;;  %v556_v10 = vld [vmem:[#allocation3 + $0xf68] sm:$0xff]  ;;  %v4322_v22 = vcombine.low %v424_v7, %v428_v8  ;;  %v4668_v8 = vld [vmem:[#allocation5] sm:$0xff] }
  0xfa   :  { %3459 = vmatprep.subr.bf16.mxu0 %v4243_v24  ;;  %v4451_v14 = vcombine.high %v552_v9, %v556_v10  ;;  %v416_v15 = vld [vmem:[#allocation3 + $0xb08] sm:$0xff] }
  0xfb   :  { %3499 = vmatpush1.bf16.msra.mxu1 %v4378_v54  ;;  %v420_v16 = vld [vmem:[#allocation3 + $0xb28] sm:$0xff]  ;;  %v4450_v54 = vcombine.low %v552_v9, %v556_v10  ;;  %v4021_v9 = vcombine.high %v121_v1, %v125_v2 }
  0xfc   :  { %3500 = vmatprep.subr.bf16.mxu1 %v4371_v25  ;;  %v544_v18 = vld [vmem:[#allocation3 + $0xf08] sm:$0xff]  ;;  %v4315_v24 = vcombine.high %v416_v15, %v420_v16 }
  0xfd   :  { %3460 = vmatpush1.bf16.msra.mxu0 %v4242_v31  ;;  %v548_v19 = vld [vmem:[#allocation3 + $0xf28] sm:$0xff]  ;;  %v4314_v31 = vcombine.low %v416_v15, %v420_v16  ;;  %v245_v15 = vld [vmem:[#allocation3 + $0x5b0] sm:$0xff] }
  0xfe   :  { %3461 = vmatprep.subr.bf16.mxu0 %v4235_v33  ;;  %v4443_v25 = vcombine.high %v544_v18, %v548_v19  ;;  %v408_v26 = vld [vmem:[#allocation3 + $0xac8] sm:$0xff] }
  0xff   :  { %3501 = vmatpush1.bf16.msra.mxu1 %v4370_v32  ;;  %v412_v27 = vld [vmem:[#allocation3 + $0xae8] sm:$0xff]  ;;  %v4442_v32 = vcombine.low %v544_v18, %v548_v19  ;;  %v4020_v18 = vcombine.low %v121_v1, %v125_v2 }
 0x100   :  { %3502 = vmatprep.subr.bf16.mxu1 %v4363_v34  ;;  %v536_v55 = vld [vmem:[#allocation3 + $0xec8] sm:$0xff]  ;;  %v4307_v33 = vcombine.high %v408_v26, %v412_v27 }
 0x101   :  { %3462 = vmatpush1.bf16.msra.mxu0 %v4234_v41  ;;  %v540_v29 = vld [vmem:[#allocation3 + $0xee8] sm:$0xff]  ;;  %v4306_v41 = vcombine.low %v408_v26, %v412_v27  ;;  %v109_v26 = vld [vmem:[#allocation3 + $0x170] sm:$0xff] }
 0x102   :  { %3463 = vmatprep.subr.bf16.mxu0 %v4227_v43  ;;  %v4435_v34 = vcombine.high %v536_v55, %v540_v29  ;;  %v400_v35 = vld [vmem:[#allocation3 + $0xa88] sm:$0xff] }
 0x103   :  { %3503 = vmatpush1.bf16.msra.mxu1 %v4362_v42  ;;  %v404_v36 = vld [vmem:[#allocation3 + $0xaa8] sm:$0xff]  ;;  %v4434_v42 = vcombine.low %v536_v55, %v540_v29  ;;  %v233_v55 = vld [vmem:[#allocation3 + $0x550] sm:$0xff] }
 0x104   :  { %3504 = vmatprep.subr.bf16.mxu1 %v4355_v44  ;;  %v528_v38 = vld [vmem:[#allocation3 + $0xe88] sm:$0xff]  ;;  %v4299_v43 = vcombine.high %v400_v35, %v404_v36  ;;  %v237_v29 = vld [vmem:[#allocation3 + $0x570] sm:$0xff] }
 0x105   :  { %3464 = vmatpush1.bf16.msra.mxu0 %v4226_v48  ;;  %v532_v39 = vld [vmem:[#allocation3 + $0xea8] sm:$0xff]  ;;  %v4298_v48 = vcombine.low %v400_v35, %v404_v36 }
 0x106   :  { %3465 = vmatprep.subr.bf16.mxu0 %v4219_v49  ;;  %v4427_v44 = vcombine.high %v528_v38, %v532_v39  ;;  %v392_v45 = vld [vmem:[#allocation3 + $0xa48] sm:$0xff]  ;;  %v4426_v49 = vcombine.low %v528_v38, %v532_v39 }
 0x107   :  { %3505 = vmatpush1.bf16.msra.mxu1 %v4354_v23  ;;  %v396_v46 = vld [vmem:[#allocation3 + $0xa68] sm:$0xff]  ;;  %v577_v23 = vlaneseq }
 0x108   :  { %3506 = vmatprep.subr.bf16.mxu1 %v4347_v50  ;;  %v520_v20 = vld [vmem:[#allocation3 + $0xe48] sm:$0xff]  ;;  %v4291_v50 = vcombine.high %v392_v45, %v396_v46 }
 0x109   :  { %3466 = vmatpush1.bf16.msra.mxu0 %v4218_v57  ;;  %v524_v47 = vld [vmem:[#allocation3 + $0xe68] sm:$0xff] }
 0x10a   :  { %3467 = vmatprep.subr.bf16.mxu0 %v4339_v61  ;;  %v4419_v51 = vcombine.high %v520_v20, %v524_v47  ;;  %v384_v52 = vld [vmem:[#allocation3 + $0xa08] sm:$0xff]  ;;  %v4665_v61 = vshrl.u32 %v577_v23, 7 }
 0x10b   :  { %3507 = vmatpush1.bf16.msra.mxu1 %v4346_v58  ;;  %v388_v53 = vld [vmem:[#allocation3 + $0xa28] sm:$0xff]  ;;  %v4290_v58 = vcombine.low %v392_v45, %v396_v46  ;;  %v225_v46 = vld [vmem:[#allocation3 + $0x510] sm:$0xff] }
 0x10c   :  { %3508 = vmatprep.subr.bf16.mxu1 %v4467_v62  ;;  %v512_v56 = vld [vmem:[#allocation3 + $0xe08] sm:$0xff]  ;;  %v4418_v62 = vcombine.low %v520_v20, %v524_v47  ;;  %v4283_v63 = vcombine.high %v384_v52, %v388_v53  ;;  %v229_v20 = vld [vmem:[#allocation3 + $0x530] sm:$0xff] }
 0x10d   :  { %3468 = vmatpush2.bf16.msra.mxu0 %v4338_v3  ;;  %v516_v57 = vld [vmem:[#allocation3 + $0xe28] sm:$0xff]  ;;  %v249_v3 = vld [vmem:[#allocation3 + $0x5d0] sm:$0xff] }
 0x10e   :  { %3469 = vmatprep.subr.bf16.mxu0 %v4331_v5  ;;  %v4411_v0 = vcombine.high %v512_v56, %v516_v57  ;;  %v4282_v5 = vcombine.low %v384_v52, %v388_v53  ;;  %v4410_v7 = vcombine.low %v512_v56, %v516_v57  ;;  %v4125_v53 = vcombine.high %v225_v46, %v229_v20  ;;  %v89_v56 = vld [vmem:[#allocation3 + $0xd0] sm:$0xff] }
 0x10f   :  { %3509 = vmatpush2.bf16.msra.mxu1 %v4466_v4  ;;  %v253_v4 = vld [vmem:[#allocation3 + $0x5f0] sm:$0xff] }
 0x110   :  { %3510 = vmatprep.subr.bf16.mxu1 %v4459_v6  ;;  %v579_v6 = vsub.s32 0, %v4665_v61  ;;  %v4149_v10 = vcombine.high %v249_v3, %v253_v4  ;;  %v4148_v19 = vcombine.low %v249_v3, %v253_v4  ;;  %v93_v57 = vld [vmem:[#allocation3 + $0xf0] sm:$0xff] }
 0x111   :  { %3470 = vmatpush2.bf16.msra.mxu0 %v4330_v11  ;;  %v583_v11 = vsub.s32 1, %v4665_v61  ;;  %v3989_v1 = vcombine.high %v89_v56, %v93_v57  ;;  %v81_v3 = vld [vmem:[#allocation3 + $0x90] sm:$0xff] }
 0x112   :  { %3471 = vmatprep.subr.bf16.mxu0 %v4323_v13  ;;  %v117_v13 = vld [vmem:[#allocation3 + $0x1b0] sm:$0xff]  ;;  %v580_v16 = vrot.slane %v4668_v8, %v579_v6 }
 0x113   :  { %3511 = vmatpush2.bf16.msra.mxu1 %v4458_v12  ;;  %v113_v12 = vld [vmem:[#allocation3 + $0x190] sm:$0xff] }
 0x114   :  { %3512 = vmatprep.subr.bf16.mxu1 %v4451_v14  ;;  %v241_v14 = vld [vmem:[#allocation3 + $0x590] sm:$0xff] }
 0x115   :  { %3472 = vmatpush2.bf16.msra.mxu0 %v4322_v22  ;;  %v4013_v22 = vcombine.high %v113_v12, %v117_v13  ;;  %v4140_v35 = vcombine.low %v241_v14, %v245_v15  ;;  %v85_v4 = vld [vmem:[#allocation3 + $0xb0] sm:$0xff] }
 0x116   :  { %3473 = vmatprep.subr.bf16.mxu0 %v4315_v24  ;;  %v4141_v24 = vcombine.high %v241_v14, %v245_v15  ;;  %v73_v14 = vld [vmem:[#allocation3 + $0x50] sm:$0xff] }
 0x117   :  { %3513 = vmatpush2.bf16.msra.mxu1 %v4450_v54  ;;  %v584_v54 = vrot.slane %v4668_v8, %v583_v11  ;;  %v77_v15 = vld [vmem:[#allocation3 + $0x70] sm:$0xff] }
 0x118   :  { %3514 = vmatprep.subr.bf16.mxu1 %v4443_v25  ;;  %v105_v25 = vld [vmem:[#allocation3 + $0x150] sm:$0xff] }
 0x119   :  { %3474 = vmatpush2.bf16.msra.mxu0 %v4314_v31  ;;  %v4005_v36 = vcombine.high %v105_v25, %v109_v26  ;;  %v4004_v23 = vcombine.low %v105_v25, %v109_v26  ;;  %v65_v25 = vld [vmem:[#allocation3 + $0x10] sm:$0xff] }
 0x11a   :  { %3475 = vmatprep.subr.bf16.mxu0 %v4307_v33  ;;  %v4012_v33 = vcombine.low %v113_v12, %v117_v13  ;;  %v3981_v12 = vcombine.high %v81_v3, %v85_v4  ;;  %v69_v26 = vld [vmem:[#allocation3 + $0x30] sm:$0xff] }
 0x11b   :  { %3515 = vmatpush2.bf16.msra.mxu1 %v4442_v32 }
 0x11c   :  { %3516 = vmatprep.subr.bf16.mxu1 %v4435_v34 }
 0x11d   :  { %3476 = vmatpush2.bf16.msra.mxu0 %v4306_v41 }
 0x11e   :  { %3477 = vmatprep.subr.bf16.mxu0 %v4299_v43  ;;  %v97_v43 = vld [vmem:[#allocation3 + $0x110] sm:$0xff] }
 0x11f   :  { %3517 = vmatpush2.bf16.msra.mxu1 %v4434_v42  ;;  %v4133_v42 = vcombine.high %v233_v55, %v237_v29 }
 0x120   :  { %3518 = vmatprep.subr.bf16.mxu1 %v4427_v44  ;;  %v101_v44 = vld [vmem:[#allocation3 + $0x130] sm:$0xff] }
 0x121   :  { %3478 = vmatpush2.bf16.msra.mxu0 %v4298_v48 }
 0x122   :  { %3479 = vmatprep.subr.bf16.mxu0 %v4291_v50  ;;  %v4132_v50 = vcombine.low %v233_v55, %v237_v29  ;;  %v197_v55 = vld [vmem:[#allocation3 + $0x430] sm:$0xff]  ;;  %v3972_v29 = vcombine.low %v73_v14, %v77_v15 }
 0x123   :  { %3519 = vmatpush2.bf16.msra.mxu1 %v4426_v49 }
 0x124   :  { %3520 = vmatprep.subr.bf16.mxu1 %v4419_v51  ;;  %v3997_v51 = vcombine.high %v97_v43, %v101_v44 }
 0x125   :  { %3480 = vmatpush2.bf16.msra.mxu0 %v4290_v58  ;;  %v217_v58 = vld [vmem:[#allocation3 + $0x4d0] sm:$0xff] }
 0x126   :  { %3481 = vmatprep.subr.bf16.mxu0 %v4283_v63  ;;  %v3996_v63 = vcombine.low %v97_v43, %v101_v44 }
 0x127   :  { %3521 = vmatpush2.bf16.msra.mxu1 %v4418_v62  ;;  %v221_v62 = vld [vmem:[#allocation3 + $0x4f0] sm:$0xff] }
 0x128   :  { %3522 = vmatprep.subr.bf16.mxu1 %v4411_v0  ;;  %v4124_v0 = vcombine.low %v225_v46, %v229_v20  ;;  %v4117_v2 = vcombine.high %v217_v58, %v221_v62  ;;  %v181_v46 = vld [vmem:[#allocation3 + $0x3b0] sm:$0xff] }
 0x129   :  { %3482 = vmatpush2.bf16.msra.mxu0 %v4282_v5  ;;  %v209_v5 = vld [vmem:[#allocation3 + $0x490] sm:$0xff] }
 0x12a   :  { %3533 = vmatprep.subr.bf16.mxu0 %v4021_v9  ;;  %v3988_v9 = vcombine.low %v89_v56, %v93_v57  ;;  %v305_v20 = vld [vmem:[#allocation3 + $0x790] sm:$0xff] }
 0x12b   :  { %3523 = vmatpush2.bf16.msra.mxu1 %v4410_v7  ;;  %v213_v7 = vld [vmem:[#allocation3 + $0x4b0] sm:$0xff] }
 0x12c   :  { %3574 = vmatprep.subr.bf16.mxu1 %v4149_v10  ;;  %v3239_v27 = vpop.f32.mrf.mxu0  ;;  %3484 = vmatmul.mubr.bf16.vlgmr.msra.gmra.mxu0 %v4651_v37  ;;  %v4116_v10 = vcombine.low %v217_v58, %v221_v62  ;;  %v4109_v13 = vcombine.high %v209_v5, %v213_v7  ;;  %v297_v56 = vld [vmem:[#allocation3 + $0x750] sm:$0xff] }
 0x12d   :  { %v3240_v31 = vadd.f32 %v3239_v27, %v580_v16  ;;  %3534 = vmatpush1.bf16.msra.mxu0 %v4020_v18  ;;  %3565 = vmatprep.mubr.bf16.mxu0 %v4611_v59  ;;  %v201_v16 = vld [vmem:[#allocation3 + $0x450] sm:$0xff] }
 0x12e   :  { %v3280_v32 = vpop.f32.mrf.mxu1  ;;  %3525 = vmatmul.mubr.bf16.vlgmr.msra.gmra.mxu1 %v4655_v40  ;;  %v3241_v34 = vpop.f32.mrf.mxu0  ;;  %3535 = vmatprep.subr.bf16.mxu0 %v4013_v22  ;;  %v205_v18 = vld [vmem:[#allocation3 + $0x470] sm:$0xff]  ;;  %v4108_v22 = vcombine.low %v209_v5, %v213_v7 }
 0x12f   :  { %3575 = vmatpush1.bf16.msra.mxu1 %v4148_v19  ;;  %v4679_v38 = vadd.f32 %v3280_v32, %v3240_v31  ;;  %v3242_v39 = vadd.f32 %v3241_v34, %v584_v54  ;;  %3606 = vmatprep.mubr.bf16.mxu1 %v4615_v60  ;;  %v3980_v19 = vcombine.low %v81_v3, %v85_v4  ;;  %v193_v27 = vld [vmem:[#allocation3 + $0x410] sm:$0xff] }
 0x130   :  { %v3282_v41 = vpop.f32.mrf.mxu1  ;;  %3576 = vmatprep.subr.bf16.mxu1 %v4141_v24  ;;  %v3243_v45 = vpop.f32.mrf.mxu0  ;;  %v3973_v54 = vcombine.high %v73_v14, %v77_v15  ;;  %v4101_v24 = vcombine.high %v201_v16, %v205_v18  ;;  %v4100_v31 = vcombine.low %v201_v16, %v205_v18  ;;  %v3965_v32 = vcombine.high %v65_v25, %v69_v26  ;;  %v185_v34 = vld [vmem:[#allocation3 + $0x3d0] sm:$0xff] }
 0x131   :  { %v4683_v47 = vadd.f32 %v3282_v41, %v3242_v39  ;;  %3536 = vmatpush1.bf16.msra.mxu0 %v4012_v33  ;;  %v4093_v33 = vcombine.high %v193_v27, %v197_v55  ;;  %v317_v39 = vld [vmem:[#allocation3 + $0x7f0] sm:$0xff]  ;;  %v3964_v41 = vcombine.low %v65_v25, %v69_v26 }
 0x132   :  { %v3284_v48 = vpop.f32.mrf.mxu1  ;;  %v3244_v49 = vpop.f32.mrf.mxu0  ;;  %3537 = vmatprep.subr.bf16.mxu0 %v4005_v36  ;;  %v313_v36 = vld [vmem:[#allocation3 + $0x7d0] sm:$0xff] }
 0x133   :  { %3577 = vmatpush1.bf16.msra.mxu1 %v4140_v35  ;;  %v189_v35 = vld [vmem:[#allocation3 + $0x3f0] sm:$0xff]  ;;  %v4213_v44 = vcombine.high %v313_v36, %v317_v39  ;;  %v4212_v49 = vcombine.low %v313_v36, %v317_v39 }
 0x134   :  { %v3285_v52 = vpop.f32.mrf.mxu1  ;;  %3578 = vmatprep.subr.bf16.mxu1 %v4133_v42  ;;  %v4092_v42 = vcombine.low %v193_v27, %v197_v55  ;;  %v4085_v43 = vcombine.high %v185_v34, %v189_v35  ;;  %v177_v45 = vld [vmem:[#allocation3 + $0x390] sm:$0xff] }
 0x135   :  { %3538 = vmatpush1.bf16.msra.mxu0 %v4004_v23  ;;  %v309_v48 = vld [vmem:[#allocation3 + $0x7b0] sm:$0xff]  ;;  %v4084_v23 = vcombine.low %v185_v34, %v189_v35  ;;  %v4076_v58 = vcombine.low %v177_v45, %v181_v46 }
 0x136   :  { %3539 = vmatprep.subr.bf16.mxu0 %v3997_v51  ;;  %v4205_v51 = vcombine.high %v305_v20, %v309_v48  ;;  %v169_v52 = vld [vmem:[#allocation3 + $0x350] sm:$0xff]  ;;  %v4204_v62 = vcombine.low %v305_v20, %v309_v48 }
 0x137   :  { %3579 = vmatpush1.bf16.msra.mxu1 %v4132_v50  ;;  %v4077_v50 = vcombine.high %v177_v45, %v181_v46  ;;  %v301_v57 = vld [vmem:[#allocation3 + $0x770] sm:$0xff] }
 0x138   :  { %3580 = vmatprep.subr.bf16.mxu1 %v4125_v53  ;;  %v173_v53 = vld [vmem:[#allocation3 + $0x370] sm:$0xff]  ;;  %v4196_v7 = vcombine.low %v297_v56, %v301_v57 }
 0x139   :  { %3540 = vmatpush1.bf16.msra.mxu0 %v3996_v63  ;;  %v4069_v63 = vcombine.high %v169_v52, %v173_v53  ;;  %v289_v3 = vld [vmem:[#allocation3 + $0x710] sm:$0xff]  ;;  %v4068_v5 = vcombine.low %v169_v52, %v173_v53 }
 0x13a   :  { %3541 = vmatprep.subr.bf16.mxu0 %v3989_v1  ;;  %v161_v1 = vld [vmem:[#allocation3 + $0x310] sm:$0xff] }
 0x13b   :  { %3581 = vmatpush1.bf16.msra.mxu1 %v4124_v0  ;;  %v4197_v0 = vcombine.high %v297_v56, %v301_v57  ;;  %v293_v4 = vld [vmem:[#allocation3 + $0x730] sm:$0xff] }
 0x13c   :  { %3582 = vmatprep.subr.bf16.mxu1 %v4117_v2  ;;  %v165_v2 = vld [vmem:[#allocation3 + $0x330] sm:$0xff]  ;;  %v4188_v18 = vcombine.low %v289_v3, %v293_v4 }
 0x13d   :  { %3542 = vmatpush1.bf16.msra.mxu0 %v3988_v9  ;;  %v4061_v9 = vcombine.high %v161_v1, %v165_v2  ;;  %v281_v14 = vld [vmem:[#allocation3 + $0x6d0] sm:$0xff]  ;;  %v4060_v16 = vcombine.low %v161_v1, %v165_v2 }
 0x13e   :  { %3543 = vmatprep.subr.bf16.mxu0 %v3981_v12  ;;  %v153_v12 = vld [vmem:[#allocation3 + $0x2d0] sm:$0xff] }
 0x13f   :  { %3583 = vmatpush1.bf16.msra.mxu1 %v4116_v10  ;;  %v4189_v10 = vcombine.high %v289_v3, %v293_v4  ;;  %v285_v15 = vld [vmem:[#allocation3 + $0x6f0] sm:$0xff] }
 0x140   :  { %3584 = vmatprep.subr.bf16.mxu1 %v4109_v13  ;;  %v157_v13 = vld [vmem:[#allocation3 + $0x2f0] sm:$0xff]  ;;  %v4180_v55 = vcombine.low %v281_v14, %v285_v15 }
 0x141   :  { %3544 = vmatpush1.bf16.msra.mxu0 %v3980_v19  ;;  %v4053_v19 = vcombine.high %v153_v12, %v157_v13  ;;  %v273_v25 = vld [vmem:[#allocation3 + $0x690] sm:$0xff]  ;;  %v4052_v27 = vcombine.low %v153_v12, %v157_v13 }
 0x142   :  { %3545 = vmatprep.subr.bf16.mxu0 %v3973_v54  ;;  %v145_v54 = vld [vmem:[#allocation3 + $0x290] sm:$0xff] }
 0x143   :  { %3585 = vmatpush1.bf16.msra.mxu1 %v4108_v22  ;;  %v4181_v22 = vcombine.high %v281_v14, %v285_v15  ;;  %v277_v26 = vld [vmem:[#allocation3 + $0x6b0] sm:$0xff] }
 0x144   :  { %3586 = vmatprep.subr.bf16.mxu1 %v4101_v24  ;;  %v149_v24 = vld [vmem:[#allocation3 + $0x2b0] sm:$0xff]  ;;  %v4172_v39 = vcombine.low %v273_v25, %v277_v26 }
 0x145   :  { %3546 = vmatpush1.bf16.msra.mxu0 %v3972_v29  ;;  %v4045_v29 = vcombine.high %v145_v54, %v149_v24  ;;  %v265_v34 = vld [vmem:[#allocation3 + $0x650] sm:$0xff]  ;;  %v4044_v36 = vcombine.low %v145_v54, %v149_v24 }
 0x146   :  { %3547 = vmatprep.subr.bf16.mxu0 %v3965_v32  ;;  %v137_v32 = vld [vmem:[#allocation3 + $0x250] sm:$0xff] }
 0x147   :  { %3587 = vmatpush1.bf16.msra.mxu1 %v4100_v31  ;;  %v4173_v31 = vcombine.high %v273_v25, %v277_v26  ;;  %v269_v35 = vld [vmem:[#allocation3 + $0x670] sm:$0xff]  ;;  %v4688_v25 = vld [vmem:[#allocation7] sm:$0xff] }
 0x148   :  { %3588 = vmatprep.subr.bf16.mxu1 %v4093_v33  ;;  %v141_v33 = vld [vmem:[#allocation3 + $0x270] sm:$0xff]  ;;  %v4164_v48 = vcombine.low %v265_v34, %v269_v35 }
 0x149   :  { %3548 = vmatpush1.bf16.msra.mxu0 %v3964_v41  ;;  %v4037_v41 = vcombine.high %v137_v32, %v141_v33  ;;  %v257_v45 = vld [vmem:[#allocation3 + $0x610] sm:$0xff]  ;;  %v4036_v20 = vcombine.low %v137_v32, %v141_v33 }
 0x14a   :  { %3549 = vmatprep.subr.bf16.mxu0 %v4085_v43  ;;  %v129_v43 = vld [vmem:[#allocation3 + $0x210] sm:$0xff] }
 0x14b   :  { %3589 = vmatpush1.bf16.msra.mxu1 %v4092_v42  ;;  %v4165_v42 = vcombine.high %v265_v34, %v269_v35  ;;  %v261_v46 = vld [vmem:[#allocation3 + $0x630] sm:$0xff] }
 0x14c   :  { %3590 = vmatprep.subr.bf16.mxu1 %v4213_v44  ;;  %v133_v44 = vld [vmem:[#allocation3 + $0x230] sm:$0xff]  ;;  %v4156_v57 = vcombine.low %v257_v45, %v261_v46 }
 0x14d   :  { %3550 = vmatpush2.bf16.msra.mxu0 %v4084_v23  ;;  %v4029_v23 = vcombine.high %v129_v43, %v133_v44  ;;  %v505_v52 = vld [vmem:[#allocation3 + $0xdd0] sm:$0xff]  ;;  %v4028_v56 = vcombine.low %v129_v43, %v133_v44 }
 0x14e   :  { %3551 = vmatprep.subr.bf16.mxu0 %v4077_v50  ;;  %v377_v50 = vld [vmem:[#allocation3 + $0x9d0] sm:$0xff] }
 0x14f   :  { %3591 = vmatpush2.bf16.msra.mxu1 %v4212_v49  ;;  %v4157_v49 = vcombine.high %v257_v45, %v261_v46  ;;  %v509_v53 = vld [vmem:[#allocation3 + $0xdf0] sm:$0xff]  ;;  %v3886_v46 = vrot.slane %v4688_v25, %v583_v11 }
 0x150   :  { %3592 = vmatprep.subr.bf16.mxu1 %v4205_v51  ;;  %v381_v51 = vld [vmem:[#allocation3 + $0x9f0] sm:$0xff]  ;;  %v4404_v4 = vcombine.low %v505_v52, %v509_v53 }
 0x151   :  { %3552 = vmatpush2.bf16.msra.mxu0 %v4076_v58  ;;  %v4277_v58 = vcombine.high %v377_v50, %v381_v51  ;;  %v497_v1 = vld [vmem:[#allocation3 + $0xd90] sm:$0xff]  ;;  %v4276_v3 = vcombine.low %v377_v50, %v381_v51 }
 0x152   :  { %3553 = vmatprep.subr.bf16.mxu0 %v4069_v63  ;;  %v369_v63 = vld [vmem:[#allocation3 + $0x990] sm:$0xff] }
 0x153   :  { %3593 = vmatpush2.bf16.msra.mxu1 %v4204_v62  ;;  %v4405_v62 = vcombine.high %v505_v52, %v509_v53  ;;  %v501_v2 = vld [vmem:[#allocation3 + $0xdb0] sm:$0xff] }
 0x154   :  { %3594 = vmatprep.subr.bf16.mxu1 %v4197_v0  ;;  %v373_v0 = vld [vmem:[#allocation3 + $0x9b0] sm:$0xff] }
 0x155   :  { %3554 = vmatpush2.bf16.msra.mxu0 %v4068_v5  ;;  %v4269_v5 = vcombine.high %v369_v63, %v373_v0  ;;  %v489_v13 = vld [vmem:[#allocation3 + $0xd50] sm:$0xff] }
 0x156   :  { %3555 = vmatprep.subr.bf16.mxu0 %v4061_v9  ;;  %v361_v9 = vld [vmem:[#allocation3 + $0x950] sm:$0xff] }
 0x157   :  { %3595 = vmatpush2.bf16.msra.mxu1 %v4196_v7  ;;  %v4397_v7 = vcombine.high %v497_v1, %v501_v2  ;;  %v493_v14 = vld [vmem:[#allocation3 + $0xd70] sm:$0xff] }
 0x158   :  { %3596 = vmatprep.subr.bf16.mxu1 %v4189_v10  ;;  %v365_v10 = vld [vmem:[#allocation3 + $0x970] sm:$0xff] }
 0x159   :  { %3556 = vmatpush2.bf16.msra.mxu0 %v4060_v16  ;;  %v4261_v54 = vcombine.high %v361_v9, %v365_v10  ;;  %v481_v32 = vld [vmem:[#allocation3 + $0xd10] sm:$0xff] }
 0x15a   :  { %3557 = vmatprep.subr.bf16.mxu0 %v4053_v19  ;;  %v485_v33 = vld [vmem:[#allocation3 + $0xd30] sm:$0xff] }
 0x15b   :  { %3597 = vmatpush2.bf16.msra.mxu1 %v4188_v18  ;;  %v4268_v18 = vcombine.low %v369_v63, %v373_v0  ;;  %v473_v50 = vld [vmem:[#allocation3 + $0xcd0] sm:$0xff]  ;;  %v4380_v53 = vcombine.low %v481_v32, %v485_v33 }
 0x15c   :  { %3598 = vmatprep.subr.bf16.mxu1 %v4181_v22  ;;  %v4396_v22 = vcombine.low %v497_v1, %v501_v2  ;;  %v477_v51 = vld [vmem:[#allocation3 + $0xcf0] sm:$0xff] }
 0x15d   :  { %3558 = vmatpush2.bf16.msra.mxu0 %v4052_v27  ;;  %v337_v63 = vld [vmem:[#allocation3 + $0x890] sm:$0xff] }
 0x15e   :  { %3559 = vmatprep.subr.bf16.mxu0 %v4045_v29  ;;  %v353_v29 = vld [vmem:[#allocation3 + $0x910] sm:$0xff] }
 0x15f   :  { %3599 = vmatpush2.bf16.msra.mxu1 %v4180_v55  ;;  %v4389_v55 = vcombine.high %v489_v13, %v493_v14  ;;  %v341_v11 = vld [vmem:[#allocation3 + $0x8b0] sm:$0xff] }
 0x160   :  { %3600 = vmatprep.subr.bf16.mxu1 %v4173_v31  ;;  %v465_v0 = vld [vmem:[#allocation3 + $0xc90] sm:$0xff] }
 0x161   :  { %3560 = vmatpush2.bf16.msra.mxu0 %v4044_v36  ;;  %v469_v1 = vld [vmem:[#allocation3 + $0xcb0] sm:$0xff] }
 0x162   :  { %3561 = vmatprep.subr.bf16.mxu0 %v4037_v41 }
 0x163   :  { %3601 = vmatpush2.bf16.msra.mxu1 %v4172_v39  ;;  %v4260_v39 = vcombine.low %v361_v9, %v365_v10  ;;  %v329_v9 = vld [vmem:[#allocation3 + $0x850] sm:$0xff] }
 0x164   :  { %3602 = vmatprep.subr.bf16.mxu1 %v4165_v42  ;;  %v4388_v42 = vcombine.low %v489_v13, %v493_v14  ;;  %v333_v10 = vld [vmem:[#allocation3 + $0x870] sm:$0xff]  ;;  %v4236_v14 = vcombine.low %v337_v63, %v341_v11 }
 0x165   :  { %3562 = vmatpush2.bf16.msra.mxu0 %v4036_v20  ;;  %v461_v13 = vld [vmem:[#allocation3 + $0xc70] sm:$0xff] }
 0x166   :  { %3563 = vmatprep.subr.bf16.mxu0 %v4029_v23  ;;  %v345_v23 = vld [vmem:[#allocation3 + $0x8d0] sm:$0xff] }
 0x167   :  { %3603 = vmatpush2.bf16.msra.mxu1 %v4164_v48  ;;  %v4381_v48 = vcombine.high %v481_v32, %v485_v33  ;;  %v569_v32 = vld [vmem:[#allocation3 + $0xfd0] sm:$0xff] }
 0x168   :  { %3604 = vmatprep.subr.bf16.mxu1 %v4157_v49  ;;  %v349_v49 = vld [vmem:[#allocation3 + $0x8f0] sm:$0xff] }
 0x169   :  { %3564 = vmatpush2.bf16.msra.mxu0 %v4028_v56  ;;  %v4245_v56 = vcombine.high %v345_v23, %v349_v49  ;;  %v573_v33 = vld [vmem:[#allocation3 + $0xff0] sm:$0xff] }
 0x16a   :  { %3615 = vmatprep.subr.bf16.mxu0 %v4277_v58 }
 0x16b   :  { %3605 = vmatpush2.bf16.msra.mxu1 %v4156_v57 }
 0x16c   :  { %3656 = vmatprep.subr.bf16.mxu1 %v4405_v62  ;;  %v3321_v12 = vpop.f32.mrf.mxu0  ;;  %3566 = vmatmul.mubr.bf16.vlgmr.msra.gmra.mxu0 %v4621_v17  ;;  %v4373_v62 = vcombine.high %v473_v50, %v477_v51 }
 0x16d   :  { %v3322_v15 = vadd.f32 %v3321_v12, %v4679_v38  ;;  %3616 = vmatpush1.bf16.msra.mxu0 %v4276_v3  ;;  %v357_v38 = vld [vmem:[#allocation3 + $0x930] sm:$0xff]  ;;  %3647 = vmatprep.mubr.bf16.mxu0 %v4639_v28  ;;  %v4244_v3 = vcombine.low %v345_v23, %v349_v49 }
 0x16e   :  { %v3362_v16 = vpop.f32.mrf.mxu1  ;;  %3607 = vmatmul.mubr.bf16.vlgmr.msra.gmra.mxu1 %v4630_v21  ;;  %v3323_v19 = vpop.f32.mrf.mxu0  ;;  %3617 = vmatprep.subr.bf16.mxu0 %v4269_v5  ;;  %v4253_v43 = vcombine.high %v353_v29, %v357_v38  ;;  %v4237_v5 = vcombine.high %v337_v63, %v341_v11  ;;  %v457_v12 = vld [vmem:[#allocation3 + $0xc50] sm:$0xff] }
 0x16f   :  { %3657 = vmatpush1.bf16.msra.mxu1 %v4404_v4  ;;  %v3363_v24 = vadd.f32 %v3362_v16, %v3322_v15  ;;  %v3324_v26 = vadd.f32 %v3323_v19, %v4683_v47  ;;  %3688 = vmatprep.mubr.bf16.mxu1 %v4644_v30  ;;  %v3882_v47 = vrot.slane %v4688_v25, %v579_v6  ;;  %v321_v19 = vld [vmem:[#allocation3 + $0x810] sm:$0xff] }
 0x170   :  { %v3364_v27 = vpop.f32.mrf.mxu1  ;;  %3658 = vmatprep.subr.bf16.mxu1 %v4397_v7  ;;  %v3325_v31 = vpop.f32.mrf.mxu0  ;;  %v4252_v6 = vcombine.low %v353_v29, %v357_v38  ;;  %v4372_v4 = vcombine.low %v473_v50, %v477_v51  ;;  %v4365_v7 = vcombine.high %v465_v0, %v469_v1  ;;  %v4364_v15 = vcombine.low %v465_v0, %v469_v1  ;;  %v441_v38 = vld [vmem:[#allocation3 + $0xbd0] sm:$0xff] }
 0x171   :  { %v3861_v34 = vmul.f32 0.1, %v3363_v24  ;;  %v3365_v35 = vadd.f32 %v3364_v27, %v3324_v26  ;;  %3618 = vmatpush1.bf16.msra.mxu0 %v4268_v18  ;;  %v4229_v16 = vcombine.high %v329_v9, %v333_v10  ;;  %v4357_v18 = vcombine.high %v457_v12, %v461_v13  ;;  %v445_v31 = vld [vmem:[#allocation3 + $0xbf0] sm:$0xff] }
 0x172   :  { %v3366_v36 = vpop.f32.mrf.mxu1  ;;  %v3326_v41 = vpop.f32.mrf.mxu0  ;;  %3619 = vmatprep.subr.bf16.mxu0 %v4261_v54  ;;  %v449_v54 = vld [vmem:[#allocation3 + $0xc10] sm:$0xff]  ;;  %v4228_v26 = vcombine.low %v329_v9, %v333_v10  ;;  %v4356_v27 = vcombine.low %v457_v12, %v461_v13 }
 0x173   :  { %3659 = vmatpush1.bf16.msra.mxu1 %v4396_v22  ;;  %v3869_v44 = vmax.f32 %v3363_v24, %v3861_v34  ;;  %v3862_v45 = vmul.f32 0.1, %v3365_v35  ;;  %v325_v22 = vld [vmem:[#allocation3 + $0x830] sm:$0xff]  ;;  %v4341_v36 = vcombine.high %v441_v38, %v445_v31 }
 0x174   :  { %v3367_v20 = vpop.f32.mrf.mxu1  ;;  %3660 = vmatprep.subr.bf16.mxu1 %v4389_v55  ;;  %v453_v24 = vld [vmem:[#allocation3 + $0xc30] sm:$0xff]  ;;  %v4221_v55 = vcombine.high %v321_v19, %v325_v22  ;;  %v4220_v34 = vcombine.low %v321_v19, %v325_v22 }
 0x175   :  { %v3870_v52 = vmax.f32 %v3365_v35, %v3862_v45  ;;  %3620 = vmatpush1.bf16.msra.mxu0 %v4260_v39  ;;  %v3919_v57 = vmul.f32 %v3882_v47, %v3869_v44  ;;  %v4349_v29 = vcombine.high %v449_v54, %v453_v24  ;;  %v4348_v35 = vcombine.low %v449_v54, %v453_v24  ;;  %v433_v47 = vld [vmem:[#allocation3 + $0xb90] sm:$0xff] }
 0x176   :  { %3621 = vmatprep.subr.bf16.mxu0 %v4253_v43  ;;  %v4469_v39 = vcombine.high %v569_v32, %v573_v33  ;;  %v437_v41 = vld [vmem:[#allocation3 + $0xbb0] sm:$0xff]  ;;  %v4340_v44 = vcombine.low %v441_v38, %v445_v31  ;;  %v4468_v45 = vcombine.low %v569_v32, %v573_v33 }
 0x177   :  { %3661 = vmatpush1.bf16.msra.mxu1 %v4388_v42  ;;  %v3920_v58 = vmul.f32 %v3886_v46, %v3870_v52  ;;  %v561_v42 = vld [vmem:[#allocation3 + $0xf90] sm:$0xff]  ;;  %v4333_v46 = vcombine.high %v433_v47, %v437_v41  ;;  %v4332_v51 = vcombine.low %v433_v47, %v437_v41 }
 0x178   :  { %3662 = vmatprep.subr.bf16.mxu1 %v4381_v48  ;;  %v565_v43 = vld [vmem:[#allocation3 + $0xfb0] sm:$0xff] }
 0x179   :  { %v4699_v2 = vadd.f32 %v3920_v58, %v3919_v57  ;;  %3622 = vmatpush1.bf16.msra.mxu0 %v4252_v6  ;;  %v4461_v20 = vcombine.high %v561_v42, %v565_v43  ;;  %v425_v48 = vld [vmem:[#allocation3 + $0xb50] sm:$0xff]  ;;  %v4460_v52 = vcombine.low %v561_v42, %v565_v43 }
 0x17a   :  { %3623 = vmatprep.subr.bf16.mxu0 %v4245_v56  ;;  %v429_v23 = vld [vmem:[#allocation3 + $0xb70] sm:$0xff] }
 0x17b   :  { %3663 = vmatpush1.bf16.msra.mxu1 %v4380_v53  ;;  %v553_v49 = vld [vmem:[#allocation3 + $0xf50] sm:$0xff]  ;;  %v4325_v6 = vcombine.high %v425_v48, %v429_v23  ;;  %v4324_v63 = vcombine.low %v425_v48, %v429_v23  ;;  %v587_v23 = vsub.s32 2, %v4665_v61 }
 0x17c   :  { %3664 = vmatprep.subr.bf16.mxu1 %v4373_v62  ;;  %v557_v50 = vld [vmem:[#allocation3 + $0xf70] sm:$0xff] }
 0x17d   :  { %3624 = vmatpush1.bf16.msra.mxu0 %v4244_v3  ;;  %v4453_v53 = vcombine.high %v553_v49, %v557_v50  ;;  %v417_v56 = vld [vmem:[#allocation3 + $0xb10] sm:$0xff]  ;;  %v4452_v11 = vcombine.low %v553_v49, %v557_v50 }
 0x17e   :  { %3625 = vmatprep.subr.bf16.mxu0 %v4237_v5  ;;  %v421_v57 = vld [vmem:[#allocation3 + $0xb30] sm:$0xff] }
 0x17f   :  { %3665 = vmatpush1.bf16.msra.mxu1 %v4372_v4  ;;  %v545_v58 = vld [vmem:[#allocation3 + $0xf10] sm:$0xff]  ;;  %v4317_v0 = vcombine.high %v417_v56, %v421_v57  ;;  %v4316_v9 = vcombine.low %v417_v56, %v421_v57  ;;  %v242_v56 = vld [vmem:[#allocation3 + $0x598] sm:$0xff] }
 0x180   :  { %3666 = vmatprep.subr.bf16.mxu1 %v4365_v7  ;;  %v549_v62 = vld [vmem:[#allocation3 + $0xf30] sm:$0xff]  ;;  %v246_v57 = vld [vmem:[#allocation3 + $0x5b8] sm:$0xff] }
 0x181   :  { %3626 = vmatpush1.bf16.msra.mxu0 %v4236_v14  ;;  %v4445_v1 = vcombine.high %v545_v58, %v549_v62  ;;  %v409_v3 = vld [vmem:[#allocation3 + $0xad0] sm:$0xff]  ;;  %v4444_v10 = vcombine.low %v545_v58, %v549_v62  ;;  %v588_v58 = vrot.slane %v4668_v8, %v587_v23 }
 0x182   :  { %3627 = vmatprep.subr.bf16.mxu0 %v4229_v16  ;;  %v413_v4 = vld [vmem:[#allocation3 + $0xaf0] sm:$0xff] }
 0x183   :  { %3667 = vmatpush1.bf16.msra.mxu1 %v4364_v15  ;;  %v537_v5 = vld [vmem:[#allocation3 + $0xed0] sm:$0xff]  ;;  %v4309_v12 = vcombine.high %v409_v3, %v413_v4  ;;  %v4308_v19 = vcombine.low %v409_v3, %v413_v4  ;;  %v106_v3 = vld [vmem:[#allocation3 + $0x158] sm:$0xff] }
 0x184   :  { %3668 = vmatprep.subr.bf16.mxu1 %v4357_v18  ;;  %v541_v7 = vld [vmem:[#allocation3 + $0xef0] sm:$0xff]  ;;  %v110_v4 = vld [vmem:[#allocation3 + $0x178] sm:$0xff] }
 0x185   :  { %3628 = vmatpush1.bf16.msra.mxu0 %v4228_v26  ;;  %v4437_v13 = vcombine.high %v537_v5, %v541_v7  ;;  %v401_v14 = vld [vmem:[#allocation3 + $0xa90] sm:$0xff]  ;;  %v4436_v22 = vcombine.low %v537_v5, %v541_v7  ;;  %v234_v7 = vld [vmem:[#allocation3 + $0x558] sm:$0xff] }
 0x186   :  { %3629 = vmatprep.subr.bf16.mxu0 %v4221_v55  ;;  %v405_v15 = vld [vmem:[#allocation3 + $0xab0] sm:$0xff] }
 0x187   :  { %3669 = vmatpush1.bf16.msra.mxu1 %v4356_v27  ;;  %v529_v16 = vld [vmem:[#allocation3 + $0xe90] sm:$0xff]  ;;  %v4301_v54 = vcombine.high %v401_v14, %v405_v15  ;;  %v4300_v38 = vcombine.low %v401_v14, %v405_v15  ;;  %v4142_v15 = vcombine.low %v242_v56, %v246_v57 }
 0x188   :  { %3670 = vmatprep.subr.bf16.mxu1 %v4349_v29  ;;  %v533_v18 = vld [vmem:[#allocation3 + $0xeb0] sm:$0xff] }
 0x189   :  { %3630 = vmatpush1.bf16.msra.mxu0 %v4220_v34  ;;  %v4429_v24 = vcombine.high %v529_v16, %v533_v18  ;;  %v393_v26 = vld [vmem:[#allocation3 + $0xa50] sm:$0xff]  ;;  %v4428_v31 = vcombine.low %v529_v16, %v533_v18  ;;  %v4007_v16 = vcombine.high %v106_v3, %v110_v4 }
 0x18a   :  { %3631 = vmatprep.subr.bf16.mxu0 %v4341_v36  ;;  %v397_v27 = vld [vmem:[#allocation3 + $0xa70] sm:$0xff] }
 0x18b   :  { %3671 = vmatpush1.bf16.msra.mxu1 %v4348_v35  ;;  %v521_v55 = vld [vmem:[#allocation3 + $0xe50] sm:$0xff]  ;;  %v4293_v32 = vcombine.high %v393_v26, %v397_v27  ;;  %v4292_v47 = vcombine.low %v393_v26, %v397_v27  ;;  %v226_v27 = vld [vmem:[#allocation3 + $0x518] sm:$0xff] }
 0x18c   :  { %3672 = vmatprep.subr.bf16.mxu1 %v4469_v39  ;;  %v525_v29 = vld [vmem:[#allocation3 + $0xe70] sm:$0xff] }
 0x18d   :  { %3632 = vmatpush2.bf16.msra.mxu0 %v4340_v44  ;;  %v4421_v33 = vcombine.high %v521_v55, %v525_v29  ;;  %v385_v34 = vld [vmem:[#allocation3 + $0xa10] sm:$0xff]  ;;  %v4420_v41 = vcombine.low %v521_v55, %v525_v29  ;;  %v122_v44 = vld [vmem:[#allocation3 + $0x1d8] sm:$0xff] }
 0x18e   :  { %3633 = vmatprep.subr.bf16.mxu0 %v4333_v46  ;;  %v389_v35 = vld [vmem:[#allocation3 + $0xa30] sm:$0xff]  ;;  %v250_v46 = vld [vmem:[#allocation3 + $0x5d8] sm:$0xff] }
 0x18f   :  { %3673 = vmatpush2.bf16.msra.mxu1 %v4468_v45  ;;  %v513_v36 = vld [vmem:[#allocation3 + $0xe10] sm:$0xff]  ;;  %v4285_v42 = vcombine.high %v385_v34, %v389_v35  ;;  %v126_v45 = vld [vmem:[#allocation3 + $0x1f8] sm:$0xff]  ;;  %v4284_v48 = vcombine.low %v385_v34, %v389_v35 }
 0x190   :  { %3674 = vmatprep.subr.bf16.mxu1 %v4461_v20  ;;  %v517_v39 = vld [vmem:[#allocation3 + $0xe30] sm:$0xff]  ;;  %v254_v20 = vld [vmem:[#allocation3 + $0x5f8] sm:$0xff]  ;;  %v4023_v50 = vcombine.high %v122_v44, %v126_v45  ;;  %v4022_v62 = vcombine.low %v122_v44, %v126_v45 }
 0x191   :  { %3634 = vmatpush2.bf16.msra.mxu0 %v4332_v51  ;;  %v4413_v43 = vcombine.high %v513_v36, %v517_v39  ;;  %v4412_v49 = vcombine.low %v513_v36, %v517_v39  ;;  %v4151_v51 = vcombine.high %v250_v46, %v254_v20  ;;  %v230_v55 = vld [vmem:[#allocation3 + $0x538] sm:$0xff] }
 0x192   :  { %3635 = vmatprep.subr.bf16.mxu0 %v4325_v6  ;;  %v114_v6 = vld [vmem:[#allocation3 + $0x198] sm:$0xff]  ;;  %v4127_v36 = vcombine.high %v226_v27, %v230_v55 }
 0x193   :  { %3675 = vmatpush2.bf16.msra.mxu1 %v4460_v52  ;;  %v591_v52 = vsub.s32 3, %v4665_v61  ;;  %v90_v39 = vld [vmem:[#allocation3 + $0xd8] sm:$0xff] }
 0x194   :  { %3676 = vmatprep.subr.bf16.mxu1 %v4453_v53  ;;  %v118_v53 = vld [vmem:[#allocation3 + $0x1b8] sm:$0xff] }
 0x195   :  { %3636 = vmatpush2.bf16.msra.mxu0 %v4324_v63  ;;  %v4150_v63 = vcombine.low %v250_v46, %v254_v20  ;;  %v82_v45 = vld [vmem:[#allocation3 + $0x98] sm:$0xff] }
 0x196   :  { %3637 = vmatprep.subr.bf16.mxu0 %v4317_v0  ;;  %v592_v0 = vrot.slane %v4668_v8, %v591_v52  ;;  %v86_v46 = vld [vmem:[#allocation3 + $0xb8] sm:$0xff] }
 0x197   :  { %3677 = vmatpush2.bf16.msra.mxu1 %v4452_v11  ;;  %v4015_v11 = vcombine.high %v114_v6, %v118_v53  ;;  %v210_v20 = vld [vmem:[#allocation3 + $0x498] sm:$0xff] }
 0x198   :  { %3678 = vmatprep.subr.bf16.mxu1 %v4445_v1  ;;  %v4143_v1 = vcombine.high %v242_v56, %v246_v57  ;;  %v78_v56 = vld [vmem:[#allocation3 + $0x78] sm:$0xff] }
 0x199   :  { %3638 = vmatpush2.bf16.msra.mxu0 %v4316_v9  ;;  %v238_v9 = vld [vmem:[#allocation3 + $0x578] sm:$0xff] }
 0x19a   :  { %3639 = vmatprep.subr.bf16.mxu0 %v4309_v12  ;;  %v202_v57 = vld [vmem:[#allocation3 + $0x458] sm:$0xff] }
 0x19b   :  { %3679 = vmatpush2.bf16.msra.mxu1 %v4444_v10 }
 0x19c   :  { %3680 = vmatprep.subr.bf16.mxu1 %v4437_v13  ;;  %v4014_v13 = vcombine.low %v114_v6, %v118_v53  ;;  %v74_v53 = vld [vmem:[#allocation3 + $0x58] sm:$0xff] }
 0x19d   :  { %3640 = vmatpush2.bf16.msra.mxu0 %v4308_v19 }
 0x19e   :  { %3641 = vmatprep.subr.bf16.mxu0 %v4301_v54  ;;  %v98_v54 = vld [vmem:[#allocation3 + $0x118] sm:$0xff] }
 0x19f   :  { %3681 = vmatpush2.bf16.msra.mxu1 %v4436_v22  ;;  %v4135_v22 = vcombine.high %v234_v7, %v238_v9 }
 0x1a0   :  { %3682 = vmatprep.subr.bf16.mxu1 %v4429_v24  ;;  %v102_v24 = vld [vmem:[#allocation3 + $0x138] sm:$0xff] }
 0x1a1   :  { %3642 = vmatpush2.bf16.msra.mxu0 %v4300_v38  ;;  %v3999_v34 = vcombine.high %v98_v54, %v102_v24 }
 0x1a2   :  { %3643 = vmatprep.subr.bf16.mxu0 %v4293_v32 }
 0x1a3   :  { %3683 = vmatpush2.bf16.msra.mxu1 %v4428_v31  ;;  %v4006_v31 = vcombine.low %v106_v3, %v110_v4  ;;  %v70_v3 = vld [vmem:[#allocation3 + $0x38] sm:$0xff] }
 0x1a4   :  { %3684 = vmatprep.subr.bf16.mxu1 %v4421_v33  ;;  %v4134_v33 = vcombine.low %v234_v7, %v238_v9  ;;  %v194_v4 = vld [vmem:[#allocation3 + $0x418] sm:$0xff]  ;;  %v3974_v7 = vcombine.low %v74_v53, %v78_v56 }
 0x1a5   :  { %3644 = vmatpush2.bf16.msra.mxu0 %v4292_v47  ;;  %v218_v47 = vld [vmem:[#allocation3 + $0x4d8] sm:$0xff] }
 0x1a6   :  { %3645 = vmatprep.subr.bf16.mxu0 %v4285_v42  ;;  %v3998_v42 = vcombine.low %v98_v54, %v102_v24  ;;  %v178_v24 = vld [vmem:[#allocation3 + $0x398] sm:$0xff] }
 0x1a7   :  { %3685 = vmatpush2.bf16.msra.mxu1 %v4420_v41  ;;  %v222_v41 = vld [vmem:[#allocation3 + $0x4f8] sm:$0xff] }
 0x1a8   :  { %3686 = vmatprep.subr.bf16.mxu1 %v4413_v43  ;;  %v4119_v44 = vcombine.high %v218_v47, %v222_v41 }
 0x1a9   :  { %3646 = vmatpush2.bf16.msra.mxu0 %v4284_v48  ;;  %v214_v48 = vld [vmem:[#allocation3 + $0x4b8] sm:$0xff] }
 0x1aa   :  { %3697 = vmatprep.subr.bf16.mxu0 %v4023_v50  ;;  %v4118_v50 = vcombine.low %v218_v47, %v222_v41  ;;  %v4111_v6 = vcombine.high %v210_v20, %v214_v48 }
 0x1ab   :  { %3687 = vmatpush2.bf16.msra.mxu1 %v4412_v49 }
 0x1ac   :  { %3738 = vmatprep.subr.bf16.mxu1 %v4151_v51  ;;  %v3403_v5 = vpop.f32.mrf.mxu0  ;;  %3648 = vmatmul.mubr.bf16.vlgmr.msra.gmra.mxu0 %v4651_v37  ;;  %v3983_v51 = vcombine.high %v82_v45, %v86_v46 }
 0x1ad   :  { %v3404_v10 = vadd.f32 %v3403_v5, %v588_v58  ;;  %3698 = vmatpush1.bf16.msra.mxu0 %v4022_v62  ;;  %3729 = vmatprep.mubr.bf16.mxu0 %v4611_v59  ;;  %v94_v59 = vld [vmem:[#allocation3 + $0xf8] sm:$0xff]  ;;  %v3982_v62 = vcombine.low %v82_v45, %v86_v46 }
 0x1ae   :  { %v3444_v12 = vpop.f32.mrf.mxu1  ;;  %3689 = vmatmul.mubr.bf16.vlgmr.msra.gmra.mxu1 %v4655_v40  ;;  %v3405_v14 = vpop.f32.mrf.mxu0  ;;  %3699 = vmatprep.subr.bf16.mxu0 %v4015_v11  ;;  %v3991_v43 = vcombine.high %v90_v39, %v94_v59  ;;  %v3990_v49 = vcombine.low %v90_v39, %v94_v59  ;;  %v206_v58 = vld [vmem:[#allocation3 + $0x478] sm:$0xff]  ;;  %v3975_v11 = vcombine.high %v74_v53, %v78_v56 }
 0x1af   :  { %3739 = vmatpush1.bf16.msra.mxu1 %v4150_v63  ;;  %v4711_v8 = vadd.f32 %v3444_v12, %v3404_v10  ;;  %v3406_v18 = vadd.f32 %v3405_v14, %v592_v0  ;;  %3770 = vmatprep.mubr.bf16.mxu1 %v4615_v60  ;;  %v4126_v60 = vcombine.low %v226_v27, %v230_v55  ;;  %v198_v5 = vld [vmem:[#allocation3 + $0x438] sm:$0xff] }
 0x1b0   :  { %v3446_v19 = vpop.f32.mrf.mxu1  ;;  %3740 = vmatprep.subr.bf16.mxu1 %v4143_v1  ;;  %v3407_v26 = vpop.f32.mrf.mxu0  ;;  %v4110_v63 = vcombine.low %v210_v20, %v214_v48  ;;  %v4103_v0 = vcombine.high %v202_v57, %v206_v58  ;;  %v66_v1 = vld [vmem:[#allocation3 + $0x18] sm:$0xff]  ;;  %v4102_v9 = vcombine.low %v202_v57, %v206_v58  ;;  %v4095_v12 = vcombine.high %v194_v4, %v198_v5 }
 0x1b1   :  { %v4715_v29 = vadd.f32 %v3446_v19, %v3406_v18  ;;  %3700 = vmatpush1.bf16.msra.mxu0 %v4014_v13  ;;  %v3967_v10 = vcombine.high %v66_v1, %v70_v3  ;;  %v186_v13 = vld [vmem:[#allocation3 + $0x3d8] sm:$0xff]  ;;  %v3966_v18 = vcombine.low %v66_v1, %v70_v3  ;;  %v4094_v19 = vcombine.low %v194_v4, %v198_v5 }
 0x1b2   :  { %v3448_v38 = vpop.f32.mrf.mxu1  ;;  %v3408_v32 = vpop.f32.mrf.mxu0  ;;  %3701 = vmatprep.subr.bf16.mxu0 %v4007_v16  ;;  %v190_v14 = vld [vmem:[#allocation3 + $0x3f8] sm:$0xff] }
 0x1b3   :  { %3741 = vmatpush1.bf16.msra.mxu1 %v4142_v15  ;;  %v314_v15 = vld [vmem:[#allocation3 + $0x7d8] sm:$0xff]  ;;  %v4086_v38 = vcombine.low %v186_v13, %v190_v14 }
 0x1b4   :  { %v3449_v35 = vpop.f32.mrf.mxu1  ;;  %3742 = vmatprep.subr.bf16.mxu1 %v4135_v22  ;;  %v318_v16 = vld [vmem:[#allocation3 + $0x7f8] sm:$0xff]  ;;  %v4087_v22 = vcombine.high %v186_v13, %v190_v14 }
 0x1b5   :  { %3702 = vmatpush1.bf16.msra.mxu0 %v4006_v31  ;;  %v4215_v54 = vcombine.high %v314_v15, %v318_v16  ;;  %v182_v26 = vld [vmem:[#allocation3 + $0x3b8] sm:$0xff]  ;;  %v4214_v31 = vcombine.low %v314_v15, %v318_v16 }
 0x1b6   :  { %3703 = vmatprep.subr.bf16.mxu0 %v3999_v34  ;;  %v306_v27 = vld [vmem:[#allocation3 + $0x798] sm:$0xff]  ;;  %v4079_v32 = vcombine.high %v178_v24, %v182_v26  ;;  %v4078_v59 = vcombine.low %v178_v24, %v182_v26 }
 0x1b7   :  { %3743 = vmatpush1.bf16.msra.mxu1 %v4134_v33  ;;  %v310_v55 = vld [vmem:[#allocation3 + $0x7b8] sm:$0xff] }
 0x1b8   :  { %3744 = vmatprep.subr.bf16.mxu1 %v4127_v36  ;;  %v4207_v33 = vcombine.high %v306_v27, %v310_v55  ;;  %v170_v34 = vld [vmem:[#allocation3 + $0x358] sm:$0xff]  ;;  %v4206_v47 = vcombine.low %v306_v27, %v310_v55 }
 0x1b9   :  { %3704 = vmatpush1.bf16.msra.mxu0 %v3998_v42  ;;  %v174_v35 = vld [vmem:[#allocation3 + $0x378] sm:$0xff] }
 0x1ba   :  { %3705 = vmatprep.subr.bf16.mxu0 %v3991_v43  ;;  %v298_v36 = vld [vmem:[#allocation3 + $0x758] sm:$0xff]  ;;  %v4071_v41 = vcombine.high %v170_v34, %v174_v35  ;;  %v4070_v46 = vcombine.low %v170_v34, %v174_v35 }
 0x1bb   :  { %3745 = vmatpush1.bf16.msra.mxu1 %v4126_v60  ;;  %v302_v39 = vld [vmem:[#allocation3 + $0x778] sm:$0xff] }
 0x1bc   :  { %3746 = vmatprep.subr.bf16.mxu1 %v4119_v44  ;;  %v4199_v42 = vcombine.high %v298_v36, %v302_v39  ;;  %v162_v60 = vld [vmem:[#allocation3 + $0x318] sm:$0xff]  ;;  %v4198_v20 = vcombine.low %v298_v36, %v302_v39 }
 0x1bd   :  { %3706 = vmatpush1.bf16.msra.mxu0 %v3990_v49  ;;  %v166_v43 = vld [vmem:[#allocation3 + $0x338] sm:$0xff] }
 0x1be   :  { %3707 = vmatprep.subr.bf16.mxu0 %v3983_v51  ;;  %v290_v44 = vld [vmem:[#allocation3 + $0x718] sm:$0xff]  ;;  %v4063_v48 = vcombine.high %v162_v60, %v166_v43  ;;  %v4062_v56 = vcombine.low %v162_v60, %v166_v43 }
 0x1bf   :  { %3747 = vmatpush1.bf16.msra.mxu1 %v4118_v50  ;;  %v294_v45 = vld [vmem:[#allocation3 + $0x738] sm:$0xff] }
 0x1c0   :  { %3748 = vmatprep.subr.bf16.mxu1 %v4111_v6  ;;  %v4191_v49 = vcombine.high %v290_v44, %v294_v45  ;;  %v154_v50 = vld [vmem:[#allocation3 + $0x2d8] sm:$0xff]  ;;  %v4190_v57 = vcombine.low %v290_v44, %v294_v45 }
 0x1c1   :  { %3708 = vmatpush1.bf16.msra.mxu0 %v3982_v62  ;;  %v158_v51 = vld [vmem:[#allocation3 + $0x2f8] sm:$0xff] }
 0x1c2   :  { %3709 = vmatprep.subr.bf16.mxu0 %v3975_v11  ;;  %v282_v6 = vld [vmem:[#allocation3 + $0x6d8] sm:$0xff]  ;;  %v4055_v58 = vcombine.high %v154_v50, %v158_v51  ;;  %v4054_v3 = vcombine.low %v154_v50, %v158_v51 }
 0x1c3   :  { %3749 = vmatpush1.bf16.msra.mxu1 %v4110_v63  ;;  %v286_v53 = vld [vmem:[#allocation3 + $0x6f8] sm:$0xff] }
 0x1c4   :  { %3750 = vmatprep.subr.bf16.mxu1 %v4103_v0  ;;  %v4183_v62 = vcombine.high %v282_v6, %v286_v53  ;;  %v146_v63 = vld [vmem:[#allocation3 + $0x298] sm:$0xff]  ;;  %v4182_v4 = vcombine.low %v282_v6, %v286_v53 }
 0x1c5   :  { %3710 = vmatpush1.bf16.msra.mxu0 %v3974_v7  ;;  %v150_v11 = vld [vmem:[#allocation3 + $0x2b8] sm:$0xff] }
 0x1c6   :  { %3711 = vmatprep.subr.bf16.mxu0 %v3967_v10  ;;  %v274_v0 = vld [vmem:[#allocation3 + $0x698] sm:$0xff]  ;;  %v4047_v5 = vcombine.high %v146_v63, %v150_v11  ;;  %v4046_v14 = vcombine.low %v146_v63, %v150_v11 }
 0x1c7   :  { %3751 = vmatpush1.bf16.msra.mxu1 %v4102_v9  ;;  %v278_v1 = vld [vmem:[#allocation3 + $0x6b8] sm:$0xff] }
 0x1c8   :  { %3752 = vmatprep.subr.bf16.mxu1 %v4095_v12  ;;  %v4175_v7 = vcombine.high %v274_v0, %v278_v1  ;;  %v138_v9 = vld [vmem:[#allocation3 + $0x258] sm:$0xff]  ;;  %v4174_v15 = vcombine.low %v274_v0, %v278_v1 }
 0x1c9   :  { %3712 = vmatpush1.bf16.msra.mxu0 %v3966_v18  ;;  %v142_v10 = vld [vmem:[#allocation3 + $0x278] sm:$0xff] }
 0x1ca   :  { %3713 = vmatprep.subr.bf16.mxu0 %v4087_v22  ;;  %v266_v12 = vld [vmem:[#allocation3 + $0x658] sm:$0xff]  ;;  %v4039_v16 = vcombine.high %v138_v9, %v142_v10  ;;  %v4038_v26 = vcombine.low %v138_v9, %v142_v10 }
 0x1cb   :  { %3753 = vmatpush1.bf16.msra.mxu1 %v4094_v19  ;;  %v270_v13 = vld [vmem:[#allocation3 + $0x678] sm:$0xff] }
 0x1cc   :  { %3754 = vmatprep.subr.bf16.mxu1 %v4215_v54  ;;  %v4167_v18 = vcombine.high %v266_v12, %v270_v13  ;;  %v130_v19 = vld [vmem:[#allocation3 + $0x218] sm:$0xff]  ;;  %v4166_v27 = vcombine.low %v266_v12, %v270_v13 }
 0x1cd   :  { %3714 = vmatpush2.bf16.msra.mxu0 %v4086_v38  ;;  %v134_v22 = vld [vmem:[#allocation3 + $0x238] sm:$0xff] }
 0x1ce   :  { %3715 = vmatprep.subr.bf16.mxu0 %v4079_v32  ;;  %v258_v54 = vld [vmem:[#allocation3 + $0x618] sm:$0xff]  ;;  %v4031_v55 = vcombine.high %v130_v19, %v134_v22  ;;  %v4030_v35 = vcombine.low %v130_v19, %v134_v22 }
 0x1cf   :  { %3755 = vmatpush2.bf16.msra.mxu1 %v4214_v31  ;;  %v262_v24 = vld [vmem:[#allocation3 + $0x638] sm:$0xff] }
 0x1d0   :  { %3756 = vmatprep.subr.bf16.mxu1 %v4207_v33  ;;  %v4159_v38 = vcombine.high %v258_v54, %v262_v24  ;;  %v378_v31 = vld [vmem:[#allocation3 + $0x9d8] sm:$0xff]  ;;  %v4158_v36 = vcombine.low %v258_v54, %v262_v24 }
 0x1d1   :  { %3716 = vmatpush2.bf16.msra.mxu0 %v4078_v59  ;;  %v382_v32 = vld [vmem:[#allocation3 + $0x9f8] sm:$0xff] }
 0x1d2   :  { %3717 = vmatprep.subr.bf16.mxu0 %v4071_v41  ;;  %v506_v33 = vld [vmem:[#allocation3 + $0xdd8] sm:$0xff]  ;;  %v4279_v39 = vcombine.high %v378_v31, %v382_v32  ;;  %v4278_v43 = vcombine.low %v378_v31, %v382_v32 }
 0x1d3   :  { %3757 = vmatpush2.bf16.msra.mxu1 %v4206_v47  ;;  %v510_v34 = vld [vmem:[#allocation3 + $0xdf8] sm:$0xff] }
 0x1d4   :  { %3758 = vmatprep.subr.bf16.mxu1 %v4199_v42  ;;  %v4407_v59 = vcombine.high %v506_v33, %v510_v34  ;;  %v370_v47 = vld [vmem:[#allocation3 + $0x998] sm:$0xff]  ;;  %v4406_v44 = vcombine.low %v506_v33, %v510_v34 }
 0x1d5   :  { %3718 = vmatpush2.bf16.msra.mxu0 %v4070_v46  ;;  %v374_v41 = vld [vmem:[#allocation3 + $0x9b8] sm:$0xff] }
 0x1d6   :  { %3719 = vmatprep.subr.bf16.mxu0 %v4063_v48  ;;  %v498_v42 = vld [vmem:[#allocation3 + $0xd98] sm:$0xff]  ;;  %v4271_v45 = vcombine.high %v370_v47, %v374_v41 }
 0x1d7   :  { %3759 = vmatpush2.bf16.msra.mxu1 %v4198_v20  ;;  %v502_v60 = vld [vmem:[#allocation3 + $0xdb8] sm:$0xff] }
 0x1d8   :  { %3760 = vmatprep.subr.bf16.mxu1 %v4191_v49  ;;  %v4399_v46 = vcombine.high %v498_v42, %v502_v60  ;;  %v362_v20 = vld [vmem:[#allocation3 + $0x958] sm:$0xff] }
 0x1d9   :  { %3720 = vmatpush2.bf16.msra.mxu0 %v4062_v56  ;;  %v366_v48 = vld [vmem:[#allocation3 + $0x978] sm:$0xff]  ;;  %v4270_v56 = vcombine.low %v370_v47, %v374_v41 }
 0x1da   :  { %3721 = vmatprep.subr.bf16.mxu0 %v4055_v58  ;;  %v490_v50 = vld [vmem:[#allocation3 + $0xd58] sm:$0xff]  ;;  %v4398_v58 = vcombine.low %v498_v42, %v502_v60 }
 0x1db   :  { %3761 = vmatpush2.bf16.msra.mxu1 %v4190_v57  ;;  %v494_v51 = vld [vmem:[#allocation3 + $0xd78] sm:$0xff] }
 0x1dc   :  { %3762 = vmatprep.subr.bf16.mxu1 %v4183_v62  ;;  %v4263_v62 = vcombine.high %v362_v20, %v366_v48  ;;  %v354_v1 = vld [vmem:[#allocation3 + $0x918] sm:$0xff]  ;;  %v4390_v13 = vcombine.low %v490_v50, %v494_v51 }
 0x1dd   :  { %3722 = vmatpush2.bf16.msra.mxu0 %v4054_v3  ;;  %v358_v3 = vld [vmem:[#allocation3 + $0x938] sm:$0xff] }
 0x1de   :  { %3723 = vmatprep.subr.bf16.mxu0 %v4047_v5  ;;  %v346_v19 = vld [vmem:[#allocation3 + $0x8d8] sm:$0xff] }
 0x1df   :  { %3763 = vmatpush2.bf16.msra.mxu1 %v4182_v4  ;;  %v482_v4 = vld [vmem:[#allocation3 + $0xd18] sm:$0xff] }
 0x1e0   :  { %3764 = vmatprep.subr.bf16.mxu1 %v4175_v7  ;;  %v3890_v7 = vrot.slane %v4688_v25, %v587_v23  ;;  %v350_v23 = vld [vmem:[#allocation3 + $0x8f8] sm:$0xff] }
 0x1e1   :  { %3724 = vmatpush2.bf16.msra.mxu0 %v4046_v14  ;;  %v4255_v14 = vcombine.high %v354_v1, %v358_v3  ;;  %v474_v22 = vld [vmem:[#allocation3 + $0xcd8] sm:$0xff] }
 0x1e2   :  { %3725 = vmatprep.subr.bf16.mxu0 %v4039_v16  ;;  %v478_v54 = vld [vmem:[#allocation3 + $0xcf8] sm:$0xff] }
 0x1e3   :  { %3765 = vmatpush2.bf16.msra.mxu1 %v4174_v15  ;;  %v342_v33 = vld [vmem:[#allocation3 + $0x8b8] sm:$0xff] }
 0x1e4   :  { %3766 = vmatprep.subr.bf16.mxu1 %v4167_v18  ;;  %v466_v34 = vld [vmem:[#allocation3 + $0xc98] sm:$0xff] }
 0x1e5   :  { %3726 = vmatpush2.bf16.msra.mxu0 %v4038_v26  ;;  %v330_v42 = vld [vmem:[#allocation3 + $0x858] sm:$0xff] }
 0x1e6   :  { %3727 = vmatprep.subr.bf16.mxu0 %v4031_v55  ;;  %v334_v60 = vld [vmem:[#allocation3 + $0x878] sm:$0xff] }
 0x1e7   :  { %3767 = vmatpush2.bf16.msra.mxu1 %v4166_v27  ;;  %v4254_v27 = vcombine.low %v354_v1, %v358_v3 }
 0x1e8   :  { %3768 = vmatprep.subr.bf16.mxu1 %v4159_v38  ;;  %v4247_v38 = vcombine.high %v346_v19, %v350_v23 }
 0x1e9   :  { %3728 = vmatpush2.bf16.msra.mxu0 %v4030_v35  ;;  %v470_v35 = vld [vmem:[#allocation3 + $0xcb8] sm:$0xff] }
 0x1ea   :  { %3779 = vmatprep.subr.bf16.mxu0 %v4279_v39  ;;  %v4246_v39 = vcombine.low %v346_v19, %v350_v23  ;;  %v4367_v41 = vcombine.high %v466_v34, %v470_v35  ;;  %v418_v19 = vld [vmem:[#allocation3 + $0xb18] sm:$0xff] }
 0x1eb   :  { %3769 = vmatpush2.bf16.msra.mxu1 %v4158_v36  ;;  %v422_v23 = vld [vmem:[#allocation3 + $0xb38] sm:$0xff] }
 0x1ec   :  { %3820 = vmatprep.subr.bf16.mxu1 %v4407_v59  ;;  %v3485_v49 = vpop.f32.mrf.mxu0  ;;  %3730 = vmatmul.mubr.bf16.vlgmr.msra.gmra.mxu0 %v4621_v17  ;;  %v4391_v17 = vcombine.high %v490_v50, %v494_v51  ;;  %v4374_v59 = vcombine.low %v474_v22, %v478_v54  ;;  %v450_v50 = vld [vmem:[#allocation3 + $0xc18] sm:$0xff] }
 0x1ed   :  { %v3486_v6 = vadd.f32 %v3485_v49, %v4711_v8  ;;  %3780 = vmatpush1.bf16.msra.mxu0 %v4278_v43  ;;  %3811 = vmatprep.mubr.bf16.mxu0 %v4639_v28  ;;  %v462_v43 = vld [vmem:[#allocation3 + $0xc78] sm:$0xff] }
 0x1ee   :  { %v3526_v53 = vpop.f32.mrf.mxu1  ;;  %3771 = vmatmul.mubr.bf16.vlgmr.msra.gmra.mxu1 %v4630_v21  ;;  %v3487_v57 = vpop.f32.mrf.mxu0  ;;  %3781 = vmatprep.subr.bf16.mxu0 %v4271_v45  ;;  %v486_v21 = vld [vmem:[#allocation3 + $0xd38] sm:$0xff]  ;;  %v4366_v45 = vcombine.low %v466_v34, %v470_v35 }
 0x1ef   :  { %3821 = vmatpush1.bf16.msra.mxu1 %v4406_v44  ;;  %v3527_v63 = vadd.f32 %v3526_v53, %v3486_v6  ;;  %v3488_v11 = vadd.f32 %v3487_v57, %v4715_v29  ;;  %3852 = vmatprep.mubr.bf16.mxu1 %v4644_v30  ;;  %v4262_v29 = vcombine.low %v362_v20, %v366_v48  ;;  %v322_v48 = vld [vmem:[#allocation3 + $0x818] sm:$0xff] }
 0x1f0   :  { %v3528_v0 = vpop.f32.mrf.mxu1  ;;  %3822 = vmatprep.subr.bf16.mxu1 %v4399_v46  ;;  %v3489_v8 = vpop.f32.mrf.mxu0  ;;  %v3894_v30 = vrot.slane %v4688_v25, %v591_v52  ;;  %v4383_v18 = vcombine.high %v482_v4, %v486_v21  ;;  %v4382_v55 = vcombine.low %v482_v4, %v486_v21  ;;  %v4375_v25 = vcombine.high %v474_v22, %v478_v54  ;;  %v338_v52 = vld [vmem:[#allocation3 + $0x898] sm:$0xff] }
 0x1f1   :  { %v3863_v5 = vmul.f32 0.1, %v3527_v63  ;;  %v3529_v9 = vadd.f32 %v3528_v0, %v3488_v11  ;;  %3782 = vmatpush1.bf16.msra.mxu0 %v4270_v56  ;;  %v4239_v47 = vcombine.high %v338_v52, %v342_v33  ;;  %v4238_v44 = vcombine.low %v338_v52, %v342_v33  ;;  %v326_v49 = vld [vmem:[#allocation3 + $0x838] sm:$0xff] }
 0x1f2   :  { %v3530_v10 = vpop.f32.mrf.mxu1  ;;  %v3490_v12 = vpop.f32.mrf.mxu0  ;;  %3783 = vmatprep.subr.bf16.mxu0 %v4263_v62  ;;  %v4231_v46 = vcombine.high %v330_v42, %v334_v60  ;;  %v454_v51 = vld [vmem:[#allocation3 + $0xc38] sm:$0xff]  ;;  %v4230_v6 = vcombine.low %v330_v42, %v334_v60  ;;  %v4223_v56 = vcombine.high %v322_v48, %v326_v49  ;;  %v4222_v0 = vcombine.low %v322_v48, %v326_v49 }
 0x1f3   :  { %3823 = vmatpush1.bf16.msra.mxu1 %v4398_v58  ;;  %v3871_v28 = vmax.f32 %v3527_v63, %v3863_v5  ;;  %v3864_v15 = vmul.f32 0.1, %v3529_v9  ;;  %v4351_v57 = vcombine.high %v450_v50, %v454_v51  ;;  %v442_v58 = vld [vmem:[#allocation3 + $0xbd8] sm:$0xff]  ;;  %v4318_v52 = vcombine.low %v418_v19, %v422_v23 }
 0x1f4   :  { %v3531_v16 = vpop.f32.mrf.mxu1  ;;  %3824 = vmatprep.subr.bf16.mxu1 %v4391_v17  ;;  %v446_v62 = vld [vmem:[#allocation3 + $0xbf8] sm:$0xff]  ;;  %v4350_v17 = vcombine.low %v450_v50, %v454_v51 }
 0x1f5   :  { %v3921_v24 = vmul.f32 %v3890_v7, %v3871_v28  ;;  %v3872_v26 = vmax.f32 %v3529_v9, %v3864_v15  ;;  %3784 = vmatpush1.bf16.msra.mxu0 %v4262_v29  ;;  %v570_v63 = vld [vmem:[#allocation3 + $0xfd8] sm:$0xff]  ;;  %v4343_v1 = vcombine.high %v442_v58, %v446_v62  ;;  %v4342_v7 = vcombine.low %v442_v58, %v446_v62 }
 0x1f6   :  { %3785 = vmatprep.subr.bf16.mxu0 %v4255_v14  ;;  %v574_v11 = vld [vmem:[#allocation3 + $0xff8] sm:$0xff] }
 0x1f7   :  { %3825 = vmatpush1.bf16.msra.mxu1 %v4390_v13  ;;  %v3928_v31 = vadd.f32 %v4699_v2, %v3921_v24  ;;  %v3922_v32 = vmul.f32 %v3894_v30, %v3872_v26  ;;  %v458_v2 = vld [vmem:[#allocation3 + $0xc58] sm:$0xff]  ;;  %v4471_v3 = vcombine.high %v570_v63, %v574_v11  ;;  %v4470_v9 = vcombine.low %v570_v63, %v574_v11 }
 0x1f8   :  { %3826 = vmatprep.subr.bf16.mxu1 %v4383_v18  ;;  %v4359_v20 = vcombine.high %v458_v2, %v462_v43  ;;  %v4358_v53 = vcombine.low %v458_v2, %v462_v43  ;;  %v434_v8 = vld [vmem:[#allocation3 + $0xb98] sm:$0xff] }
 0x1f9   :  { %v4730_v36 = vadd.f32 %v3928_v31, %v3922_v32  ;;  %3786 = vmatpush1.bf16.msra.mxu0 %v4254_v27  ;;  %v438_v4 = vld [vmem:[#allocation3 + $0xbb8] sm:$0xff]  ;;  %v4319_v27 = vcombine.high %v418_v19, %v422_v23 }
 0x1fa   :  { %3787 = vmatprep.subr.bf16.mxu0 %v4247_v38  ;;  %v562_v21 = vld [vmem:[#allocation3 + $0xf98] sm:$0xff]  ;;  %v4335_v10 = vcombine.high %v434_v8, %v438_v4  ;;  %v4334_v15 = vcombine.low %v434_v8, %v438_v4  ;;  %v4486_v8 = vld [vmem:[#allocation5] sm:$0xff] }
 0x1fb   :  { %3827 = vmatpush1.bf16.msra.mxu1 %v4382_v55  ;;  %v566_v5 = vld [vmem:[#allocation3 + $0xfb8] sm:$0xff] }
 0x1fc   :  { %3828 = vmatprep.subr.bf16.mxu1 %v4375_v25  ;;  %v4463_v29 = vcombine.high %v562_v21, %v566_v5  ;;  %v426_v12 = vld [vmem:[#allocation3 + $0xb58] sm:$0xff]  ;;  %v4462_v30 = vcombine.low %v562_v21, %v566_v5 }
 0x1fd   :  { %3788 = vmatpush1.bf16.msra.mxu0 %v4246_v39  ;;  %v430_v13 = vld [vmem:[#allocation3 + $0xb78] sm:$0xff] }
 0x1fe   :  { %3789 = vmatprep.subr.bf16.mxu0 %v4239_v47  ;;  %v554_v14 = vld [vmem:[#allocation3 + $0xf58] sm:$0xff]  ;;  %v4327_v16 = vcombine.high %v426_v12, %v430_v13  ;;  %v4326_v24 = vcombine.low %v426_v12, %v430_v13 }
 0x1ff   :  { %3829 = vmatpush1.bf16.msra.mxu1 %v4374_v59  ;;  %v558_v28 = vld [vmem:[#allocation3 + $0xf78] sm:$0xff] }
 0x200   :  { %3830 = vmatprep.subr.bf16.mxu1 %v4367_v41  ;;  %v4455_v18 = vcombine.high %v554_v14, %v558_v28  ;;  %v546_v22 = vld [vmem:[#allocation3 + $0xf18] sm:$0xff]  ;;  %v4454_v26 = vcombine.low %v554_v14, %v558_v28 }
 0x201   :  { %3790 = vmatpush1.bf16.msra.mxu0 %v4238_v44  ;;  %v550_v54 = vld [vmem:[#allocation3 + $0xf38] sm:$0xff] }
 0x202   :  { %3791 = vmatprep.subr.bf16.mxu0 %v4231_v46  ;;  %v4447_v55 = vcombine.high %v546_v22, %v550_v54  ;;  %v410_v38 = vld [vmem:[#allocation3 + $0xad8] sm:$0xff]  ;;  %v4446_v33 = vcombine.low %v546_v22, %v550_v54 }
 0x203   :  { %3831 = vmatpush1.bf16.msra.mxu1 %v4366_v45  ;;  %v414_v31 = vld [vmem:[#allocation3 + $0xaf8] sm:$0xff] }
 0x204   :  { %3832 = vmatprep.subr.bf16.mxu1 %v4359_v20  ;;  %v538_v32 = vld [vmem:[#allocation3 + $0xed8] sm:$0xff]  ;;  %v4311_v34 = vcombine.high %v410_v38, %v414_v31  ;;  %v4310_v42 = vcombine.low %v410_v38, %v414_v31 }
 0x205   :  { %3792 = vmatpush1.bf16.msra.mxu0 %v4230_v6  ;;  %v542_v25 = vld [vmem:[#allocation3 + $0xef8] sm:$0xff] }
 0x206   :  { %3793 = vmatprep.subr.bf16.mxu0 %v4223_v56  ;;  %v4439_v35 = vcombine.high %v538_v32, %v542_v25  ;;  %v402_v39 = vld [vmem:[#allocation3 + $0xa98] sm:$0xff]  ;;  %v4438_v60 = vcombine.low %v538_v32, %v542_v25 }
 0x207   :  { %3833 = vmatpush1.bf16.msra.mxu1 %v4358_v53  ;;  %v406_v59 = vld [vmem:[#allocation3 + $0xab8] sm:$0xff] }
 0x208   :  { %3834 = vmatprep.subr.bf16.mxu1 %v4351_v57  ;;  %v530_v47 = vld [vmem:[#allocation3 + $0xe98] sm:$0xff]  ;;  %v4303_v2 = vcombine.high %v402_v39, %v406_v59  ;;  %v4302_v48 = vcombine.low %v402_v39, %v406_v59 }
 0x209   :  { %3794 = vmatpush1.bf16.msra.mxu0 %v4222_v0  ;;  %v534_v41 = vld [vmem:[#allocation3 + $0xeb8] sm:$0xff] }
 0x20a   :  { %3795 = vmatprep.subr.bf16.mxu0 %v4343_v1  ;;  %v4431_v43 = vcombine.high %v530_v47, %v534_v41  ;;  %v394_v44 = vld [vmem:[#allocation3 + $0xa58] sm:$0xff]  ;;  %v4430_v49 = vcombine.low %v530_v47, %v534_v41 }
 0x20b   :  { %3835 = vmatpush1.bf16.msra.mxu1 %v4350_v17  ;;  %v398_v45 = vld [vmem:[#allocation3 + $0xa78] sm:$0xff]  ;;  %v595_v17 = vsub.s32 4, %v4665_v61 }
 0x20c   :  { %3836 = vmatprep.subr.bf16.mxu1 %v4471_v3  ;;  %v522_v46 = vld [vmem:[#allocation3 + $0xe58] sm:$0xff]  ;;  %v4295_v50 = vcombine.high %v394_v44, %v398_v45  ;;  %v4294_v58 = vcombine.low %v394_v44, %v398_v45  ;;  %v599_v3 = vsub.s32 5, %v4665_v61 }
 0x20d   :  { %3796 = vmatpush2.bf16.msra.mxu0 %v4342_v7  ;;  %v526_v20 = vld [vmem:[#allocation3 + $0xe78] sm:$0xff]  ;;  %v596_v4 = vrot.slane %v4486_v8, %v595_v17 }
 0x20e   :  { %3797 = vmatprep.subr.bf16.mxu0 %v4335_v10  ;;  %v4423_v51 = vcombine.high %v522_v46, %v526_v20  ;;  %v386_v6 = vld [vmem:[#allocation3 + $0xa18] sm:$0xff]  ;;  %v4422_v62 = vcombine.low %v522_v46, %v526_v20  ;;  %v600_v21 = vrot.slane %v4486_v8, %v599_v3 }
 0x20f   :  { %3837 = vmatpush2.bf16.msra.mxu1 %v4470_v9  ;;  %v390_v53 = vld [vmem:[#allocation3 + $0xa38] sm:$0xff] }
 0x210   :  { %3838 = vmatprep.subr.bf16.mxu1 %v4463_v29  ;;  %v514_v56 = vld [vmem:[#allocation3 + $0xe18] sm:$0xff]  ;;  %v4287_v63 = vcombine.high %v386_v6, %v390_v53  ;;  %v4286_v0 = vcombine.low %v386_v6, %v390_v53 }
 0x211   :  { %3798 = vmatpush2.bf16.msra.mxu0 %v4334_v15  ;;  %v518_v57 = vld [vmem:[#allocation3 + $0xe38] sm:$0xff] }
 0x212   :  { %3799 = vmatprep.subr.bf16.mxu0 %v4327_v16  ;;  %v4415_v11 = vcombine.high %v514_v56, %v518_v57  ;;  %v4414_v1 = vcombine.low %v514_v56, %v518_v57 }
 0x213   :  { %3839 = vmatpush2.bf16.msra.mxu1 %v4462_v30 }
 0x214   :  { %3840 = vmatprep.subr.bf16.mxu1 %v4455_v18 }
 0x215   :  { %3800 = vmatpush2.bf16.msra.mxu0 %v4326_v24 }
 0x216   :  { %3801 = vmatprep.subr.bf16.mxu0 %v4319_v27 }
 0x217   :  { %3841 = vmatpush2.bf16.msra.mxu1 %v4454_v26 }
 0x218   :  { %3842 = vmatprep.subr.bf16.mxu1 %v4447_v55  ;;  %v4487_v55 = vld [vmem:[#allocation7] sm:$0xff] }
 0x219   :  { %3802 = vmatpush2.bf16.msra.mxu0 %v4318_v52 }
 0x21a   :  { %3803 = vmatprep.subr.bf16.mxu0 %v4311_v34 }
 0x21b   :  { %3843 = vmatpush2.bf16.msra.mxu1 %v4446_v33  ;;  %v3902_v33 = vrot.slane %v4487_v55, %v599_v3 }
 0x21c   :  { %3844 = vmatprep.subr.bf16.mxu1 %v4439_v35 }
 0x21d   :  { %3804 = vmatpush2.bf16.msra.mxu0 %v4310_v42 }
 0x21e   :  { %3805 = vmatprep.subr.bf16.mxu0 %v4303_v2 }
 0x21f   :  { %3845 = vmatpush2.bf16.msra.mxu1 %v4438_v60 }
 0x220   :  { %3846 = vmatprep.subr.bf16.mxu1 %v4431_v43 }
 0x221   :  { %3806 = vmatpush2.bf16.msra.mxu0 %v4302_v48  ;;  %v603_v48 = vsub.s32 6, %v4665_v61 }
 0x222   :  { %3807 = vmatprep.subr.bf16.mxu0 %v4295_v50 }
 0x223   :  { %3847 = vmatpush2.bf16.msra.mxu1 %v4430_v49  ;;  %v607_v49 = vsub.s32 7, %v4665_v61  ;;  %v604_v50 = vrot.slane %v4486_v8, %v603_v48 }
 0x224   :  { %3848 = vmatprep.subr.bf16.mxu1 %v4423_v51 }
 0x225   :  { %3808 = vmatpush2.bf16.msra.mxu0 %v4294_v58  ;;  %v608_v51 = vrot.slane %v4486_v8, %v607_v49 }
 0x226   :  { %3809 = vmatprep.subr.bf16.mxu0 %v4287_v63 }
 0x227   :  { %3849 = vmatpush2.bf16.msra.mxu1 %v4422_v62 }
 0x228   :  { %3850 = vmatprep.subr.bf16.mxu1 %v4415_v11 }
 0x229   :  { %3810 = vmatpush2.bf16.msra.mxu0 %v4286_v0 }
 0x22b   :  { %3851 = vmatpush2.bf16.msra.mxu1 %v4414_v1 }
 0x22c   :  { %v3567_v5 = vpop.f32.mrf.mxu0  ;;  %3812 = vmatmul.mubr.bf16.vlgmr.msra.gmra.mxu0 %v4651_v37 }
 0x22d   :  { %v3568_v7 = vadd.f32 %v3567_v5, %v596_v4  ;;  %v3906_v5 = vrot.slane %v4487_v55, %v603_v48 }
 0x22e   :  { %v3608_v9 = vpop.f32.mrf.mxu1  ;;  %3853 = vmatmul.mubr.bf16.vlgmr.msra.gmra.mxu1 %v4655_v40  ;;  %v3569_v10 = vpop.f32.mrf.mxu0  ;;  %v3898_v40 = vrot.slane %v4487_v55, %v595_v17 }
 0x22f   :  { %v3609_v29 = vadd.f32 %v3608_v9, %v3568_v7  ;;  %v3570_v12 = vadd.f32 %v3569_v10, %v600_v21  ;;  %v3910_v10 = vrot.slane %v4487_v55, %v607_v49 }
 0x230   :  { %v3610_v13 = vpop.f32.mrf.mxu1  ;;  %v3571_v14 = vpop.f32.mrf.mxu0 }
 0x231   :  { %v3611_v28 = vadd.f32 %v3610_v13, %v3570_v12 }
 0x232   :  { %v3612_v15 = vpop.f32.mrf.mxu1  ;;  %v3572_v30 = vpop.f32.mrf.mxu0 }
 0x233   :  { %v4472_v15 = vld [vmem:[#allocation2] ss:$0 sm:$0xff] }
 0x234   :  { %v3613_v16 = vpop.f32.mrf.mxu1 }
 0x26c   :  { %v3649_v18 = vpop.f32.mrf.mxu0 }
 0x26d   :  { %v3650_v19 = vadd.f32 %v3649_v18, %v3609_v29 }
 0x26e   :  { %v3690_v23 = vpop.f32.mrf.mxu1  ;;  %v3651_v22 = vpop.f32.mrf.mxu0 }
 0x26f   :  { %v3691_v54 = vadd.f32 %v3690_v23, %v3650_v19  ;;  %v3652_v24 = vadd.f32 %v3651_v22, %v3611_v28 }
 0x270   :  { %v3692_v37 = vpop.f32.mrf.mxu1  ;;  %v3653_v26 = vpop.f32.mrf.mxu0 }
 0x271   :  { %v3865_v27 = vmul.f32 0.1, %v3691_v54  ;;  %v3693_v38 = vadd.f32 %v3692_v37, %v3652_v24 }
 0x272   :  { %v3694_v31 = vpop.f32.mrf.mxu1  ;;  %v3654_v32 = vpop.f32.mrf.mxu0 }
 0x273   :  { %v3873_v25 = vmax.f32 %v3691_v54, %v3865_v27  ;;  %v3866_v52 = vmul.f32 0.1, %v3693_v38 }
 0x274   :  { %v3695_v34 = vpop.f32.mrf.mxu1 }
 0x275   :  { %v3923_v35 = vmul.f32 %v3898_v40, %v3873_v25  ;;  %v3874_v39 = vmax.f32 %v3693_v38, %v3866_v52 }
 0x277   :  { %v3924_v59 = vmul.f32 %v3902_v33, %v3874_v39  ;;  %v3930_v47 = vadd.f32 %v4730_v36, %v3923_v35 }
 0x279   :  { %v3931_v41 = vadd.f32 %v3930_v47, %v3924_v59 }
 0x2ac   :  { %v3731_v42 = vpop.f32.mrf.mxu0 }
 0x2ad   :  { %v3732_v6 = vadd.f32 %v3731_v42, %v604_v50 }
 0x2ae   :  { %v3772_v60 = vpop.f32.mrf.mxu1  ;;  %v3733_v2 = vpop.f32.mrf.mxu0 }
 0x2af   :  { %v3734_v53 = vadd.f32 %v3733_v2, %v608_v51  ;;  %v3773_v56 = vadd.f32 %v3772_v60, %v3732_v6 }
 0x2b0   :  { %v3774_v43 = vpop.f32.mrf.mxu1  ;;  %v3735_v44 = vpop.f32.mrf.mxu0 }
 0x2b1   :  { %v3775_v36 = vadd.f32 %v3774_v43, %v3734_v53 }
 0x2b2   :  { %v3776_v45 = vpop.f32.mrf.mxu1  ;;  %v3736_v46 = vpop.f32.mrf.mxu0 }
 0x2b4   :  { %v3777_v20 = vpop.f32.mrf.mxu1 }
 0x2ec   :  { %v3813_v57 = vpop.f32.mrf.mxu0 }
 0x2ed   :  { %v3814_v58 = vadd.f32 %v3813_v57, %v3773_v56 }
 0x2ee   :  { %v3854_v62 = vpop.f32.mrf.mxu1  ;;  %v3815_v63 = vpop.f32.mrf.mxu0 }
 0x2ef   :  { %v3855_v11 = vadd.f32 %v3854_v62, %v3814_v58  ;;  %v3816_v0 = vadd.f32 %v3815_v63, %v3775_v36 }
 0x2f0   :  { %v3856_v17 = vpop.f32.mrf.mxu1  ;;  %v3817_v1 = vpop.f32.mrf.mxu0 }
 0x2f1   :  { %v3867_v3 = vmul.f32 0.1, %v3855_v11  ;;  %v3857_v4 = vadd.f32 %v3856_v17, %v3816_v0 }
 0x2f2   :  { %v3858_v21 = vpop.f32.mrf.mxu1  ;;  %v3818_v7 = vpop.f32.mrf.mxu0 }
 0x2f3   :  { %v3875_v61 = vmax.f32 %v3855_v11, %v3867_v3  ;;  %v3868_v9 = vmul.f32 0.1, %v3857_v4 }
 0x2f4   :  { %v3859_v8 = vpop.f32.mrf.mxu1 }
 0x2f5   :  { %v3876_v29 = vmax.f32 %v3857_v4, %v3868_v9  ;;  %v3925_v12 = vmul.f32 %v3906_v5, %v3875_v61 }
 0x2f7   :  { %v3926_v13 = vmul.f32 %v3910_v10, %v3876_v29  ;;  %v3932_v14 = vadd.f32 %v3931_v41, %v3925_v12 }
 0x2f9   :  { %v3933_v28 = vadd.f32 %v3932_v14, %v3926_v13 }
 0x2fb   :  { %3934 = vadd.xlane.f32.xlu0 %v3933_v28 }
 0x384   :  { %v3935_v30 = vpop.xlane.xlu0 %3934 }
 0x385   :  { %v3943_v16 = vadd.f32 %v4472_v15, %v3935_v30 }
 0x387   :  { %3945 = vst.msk [vmem:[%s4747_s5] sm:$0xff] %vm3944_vm0, %v3943_v16 }
 0x388   :  { %3950 = vsyncpa [#allocation4], 1 }
 0x389   :  { %3951 = vsyncpa [#allocation6], 1 }

</bundles_post_ra>
